<compile_context>
chip_gen: v7x
topology: tpu7x:2x2x1
jax: 0.10.0
libtpu: 0.0.40
codegen_flags: <defaults>
</compile_context>

<pallas_src>
import jax
import jax.numpy as jnp
import numpy as np
from jax import lax
from jax.experimental import pallas as pl
from jax.experimental.pallas import tpu as pltpu

B = 2          # batch
H = W = 8      # board size (forward's .view(-1, 64) implies 8x8 spatial)
C = 128        # conv channels
NLAYERS = 8    # c1..c8 (c1's 2 input channels are zero-padded up to C)
K9 = 9 * C     # fused im2col reduction dim


def policy_kernel(x_ref, wc_ref, bc_ref, w9_ref, b9_ref, wl_ref, bl_ref,
                  out_ref, pad_ref):
    # x_ref:   (B, H, W, C)      f32 NHWC input (2 real channels, rest zero)
    # wc_ref:  (1, 9*C, C)       bf16 conv weights for THIS layer, im2col layout
    # bc_ref:  (1, 1, C)         f32 conv bias for this layer
    # w9_ref:  (1, C)            c9 (1x1 conv -> 1 channel) weight
    # b9_ref:  (1, 1)            c9 bias
    # wl_ref:  (64, 64)          l1 weight stored as (in, out)
    # bl_ref:  (1, 64)           l1 bias
    # out_ref: (B, 64)
    # pad_ref: (B, H+2, W+2, C)  f32 zero-padded activation, persists across layers
    l = pl.program_id(0)
    N = B * H * W

    @pl.when(l == 0)
    def _():
        pad_ref[...] = jnp.zeros(pad_ref.shape, pad_ref.dtype)
        pad_ref[:, 1:H + 1, 1:W + 1, :] = x_ref[...]

    # im2col: 9 shifted taps of the padded activation, concatenated along K.
    # Zero boundary comes for free from the padded scratch (no shift matmuls).
    taps = [pad_ref[:, dy:dy + H, dx:dx + W, :].reshape(N, C)
            for dy in range(3) for dx in range(3)]
    t = jnp.concatenate(taps, axis=-1).astype(jnp.bfloat16)          # (N, 9C) bf16

    # One deep-K MXU matmul per layer, f32 accumulation; bias + ReLU in f32.
    acc = jnp.dot(t, wc_ref[0], preferred_element_type=jnp.float32)  # (N, C) f32
    act = jnp.maximum(acc + bc_ref[0], 0.0)

    @pl.when(l < NLAYERS - 1)
    def _():
        pad_ref[:, 1:H + 1, 1:W + 1, :] = act.reshape(B, H, W, C)

    @pl.when(l == NLAYERS - 1)
    def _():
        # c9: 1x1 conv -> 1 channel == lane reduction, then view(-1, 64), then l1.
        a = act.reshape(B, H * W, C)
        head = jnp.sum(a * w9_ref[...].reshape(1, 1, C), axis=-1) + b9_ref[...]
        out_ref[...] = (jnp.dot(head, wl_ref[...],
                                preferred_element_type=jnp.float32) + bl_ref[...])


def init_params(key):
    # Deterministic synthetic init, PyTorch-default-like uniform(+/- 1/sqrt(fan_in)).
    def unif(k, shape, fan_in):
        b = float(fan_in) ** -0.5
        return jax.random.uniform(k, shape, jnp.float32, -b, b)

    keys = jax.random.split(key, 2 * NLAYERS + 4)
    ki = iter(keys)
    conv_ws, conv_bs = [], []
    conv_ws.append(unif(next(ki), (3, 3, 2, C), 2 * 9))       # c1 (HWIO)
    conv_bs.append(unif(next(ki), (C,), 2 * 9))
    for _ in range(NLAYERS - 1):                              # c2..c8
        conv_ws.append(unif(next(ki), (3, 3, C, C), C * 9))
        conv_bs.append(unif(next(ki), (C,), C * 9))
    w9 = unif(next(ki), (C,), C)                              # c9: Conv2d(128,1,1)
    b9 = unif(next(ki), (), C)
    wl = unif(next(ki), (64, 64), 64)                         # l1 weight as (in,out)
    bl = unif(next(ki), (64,), 64)
    return conv_ws, conv_bs, w9, b9, wl, bl


def pack_params(conv_ws, conv_bs, w9, b9, wl, bl):
    # Zero-pad c1's in-channels 2 -> C, stack all layers, and reshape HWIO
    # (3,3,C,C) -> (9*C, C) so the K ordering matches the in-kernel im2col
    # (ky-major, kx, ci).  Conv weights stored bf16 for the MXU.
    w1p = jnp.zeros((3, 3, C, C), jnp.float32).at[:, :, :2, :].set(conv_ws[0])
    wc = jnp.stack([w1p] + list(conv_ws[1:]))                 # (8, 3, 3, C, C)
    wc = wc.reshape(NLAYERS, K9, C).astype(jnp.bfloat16)      # (8, 9C, C) bf16
    bc = jnp.stack(conv_bs).reshape(NLAYERS, 1, C)            # (8, 1, C) f32
    return dict(wc=wc, bc=bc, w9=w9.reshape(1, C), b9=b9.reshape(1, 1),
                wl=wl, bl=bl.reshape(1, 64))


@jax.jit
def policy_forward(state_nchw, packed):
    # glue: NCHW -> NHWC, zero-pad the 2 input channels up to C=128
    x = jnp.transpose(state_nchw, (0, 2, 3, 1)).astype(jnp.float32)
    x = jnp.pad(x, ((0, 0), (0, 0), (0, 0), (0, C - x.shape[-1])))
    cost = pl.CostEstimate(
        flops=2 * NLAYERS * 9 * C * C * B * H * W,            # ~0.30 GFLOP conv trunk
        transcendentals=0,
        bytes_accessed=int(2 * NLAYERS * K9 * C               # bf16 conv weights
                           + 4 * B * H * W * C                # input activation
                           + 4 * (NLAYERS * C + C + 64 * 64 + 64 + 1)
                           + 4 * B * H * W))                  # output
    return pl.pallas_call(
        policy_kernel,
        out_shape=jax.ShapeDtypeStruct((B, H * W), jnp.float32),
        grid_spec=pltpu.PrefetchScalarGridSpec(
            num_scalar_prefetch=0,
            grid=(NLAYERS,),
            in_specs=[
                pl.BlockSpec((B, H, W, C), lambda l: (0, 0, 0, 0)),   # x (used at l=0)
                pl.BlockSpec((1, K9, C), lambda l: (l, 0, 0)),        # per-layer weights
                pl.BlockSpec((1, 1, C), lambda l: (l, 0, 0)),         # per-layer bias
                pl.BlockSpec((1, C), lambda l: (0, 0)),               # w9
                pl.BlockSpec((1, 1), lambda l: (0, 0)),               # b9
                pl.BlockSpec((64, 64), lambda l: (0, 0)),             # wl
                pl.BlockSpec((1, 64), lambda l: (0, 0)),              # bl
            ],
            out_specs=pl.BlockSpec((B, H * W), lambda l: (0, 0)),
            scratch_shapes=[pltpu.VMEM((B, H + 2, W + 2, C), jnp.float32)],
        ),
        compiler_params=pltpu.CompilerParams(
            dimension_semantics=("arbitrary",)),
        cost_estimate=cost,
    )(x, packed["wc"], packed["bc"], packed["w9"], packed["b9"],
      packed["wl"], packed["bl"])


def reference_forward(state_nchw, conv_ws, conv_bs, w9, b9, wl, bl):
    # Pure-JAX f32 reference matching the PyTorch forward semantics.
    x = jnp.transpose(state_nchw, (0, 2, 3, 1)).astype(jnp.float32)
    dn = ("NHWC", "HWIO", "NHWC")
    for w, bias in zip(conv_ws, conv_bs):
        x = lax.conv_general_dilated(x, w, (1, 1), "SAME", dimension_numbers=dn,
                                     precision=lax.Precision.HIGHEST)
        x = jax.nn.relu(x + bias)
    y = jnp.einsum("bhwc,c->bhw", x, w9, precision=lax.Precision.HIGHEST) + b9
    y = y.reshape(x.shape[0], H * W)                           # view(-1, 64)
    return jnp.dot(y, wl, precision=lax.Precision.HIGHEST) + bl


if __name__ == "__main__":
    key = jax.random.PRNGKey(0)
    pkey, xkey = jax.random.split(key)
    raw = init_params(pkey)
    packed = pack_params(*raw)
    state = jax.random.normal(xkey, (B, 2, H, W), jnp.float32)   # NCHW like PyTorch

    out = jax.block_until_ready(policy_forward(state, packed))
    assert out.shape == (B, 64), out.shape

    ref = reference_forward(state, *raw)
    # bf16 matmul operands with f32 accumulation vs f32 HIGHEST reference.
    np.testing.assert_allclose(np.asarray(out), np.asarray(ref),
                               rtol=5e-2, atol=5e-3)
    print("KERNEL_OK")
</pallas_src>

<mosaic_0001>
module attributes {stable_mosaic.version = 11 : i64} {
  func.func @policy_kernel(%arg0: i32, %arg1: memref<2x8x8x128xf32, #tpu.memory_space<vmem>>, %arg2: memref<1x1152x128xbf16, #tpu.memory_space<vmem>>, %arg3: memref<1x1x128xf32, #tpu.memory_space<vmem>>, %arg4: memref<1x128xf32, #tpu.memory_space<vmem>>, %arg5: memref<1x1xf32, #tpu.memory_space<vmem>>, %arg6: memref<64x64xf32, #tpu.memory_space<vmem>>, %arg7: memref<1x64xf32, #tpu.memory_space<vmem>>, %arg8: memref<2x64xf32, #tpu.memory_space<vmem>>, %arg9: memref<2x10x10x128xf32, #tpu.memory_space<vmem>>) attributes {dimension_semantics = [#tpu.dimension_semantics<arbitrary>], iteration_bounds = array<i64: 8>, scalar_prefetch = 0 : i64, scratch_operands = 1 : i64, tpu.core_type = #tpu.core_type<tc>, window_params = [{pipeline_mode = #tpu.pipeline_mode<synchronous>, transform_indices = @transform_0, window_bounds = array<i64: 2, 8, 8, 128>}, {transform_indices = @transform_1, window_bounds = array<i64: 1, 1152, 128>}, {transform_indices = @transform_2, window_bounds = array<i64: 1, 1, 128>}, {pipeline_mode = #tpu.pipeline_mode<synchronous>, transform_indices = @transform_3, window_bounds = array<i64: 1, 128>}, {pipeline_mode = #tpu.pipeline_mode<synchronous>, transform_indices = @transform_4, window_bounds = array<i64: 1, 1>}, {pipeline_mode = #tpu.pipeline_mode<synchronous>, transform_indices = @transform_5, window_bounds = array<i64: 64, 64>}, {pipeline_mode = #tpu.pipeline_mode<synchronous>, transform_indices = @transform_6, window_bounds = array<i64: 1, 64>}, {pipeline_mode = #tpu.pipeline_mode<synchronous>, transform_indices = @transform_7, window_bounds = array<i64: 2, 64>}]} {
    %c0_i32 = arith.constant 0 : i32
    %0 = arith.cmpi eq, %arg0, %c0_i32 : i32
    %1 = arith.extui %0 : i1 to i32
    %c0_i32_0 = arith.constant 0 : i32
    %2 = arith.cmpi ne, %1, %c0_i32_0 : i32
    scf.if %2 {
      %cst_44 = arith.constant 0.000000e+00 : f32
      %38 = vector.broadcast %cst_44 : f32 to vector<2x10x10x128xf32>
      %c0_45 = arith.constant 0 : index
      %c0_46 = arith.constant 0 : index
      %c0_47 = arith.constant 0 : index
      %c0_48 = arith.constant 0 : index
      %39 = vector.load %arg9[%c0_45, %c0_46, %c0_47, %c0_48] : memref<2x10x10x128xf32, #tpu.memory_space<vmem>>, vector<2x10x10x128xf32>
      tpu.vector_store %arg9[%c0_45, %c0_46, %c0_47, %c0_48], %38 {strides = array<i32>} : memref<2x10x10x128xf32, #tpu.memory_space<vmem>>, vector<2x10x10x128xf32>,
      %c0_49 = arith.constant 0 : index
      %c0_50 = arith.constant 0 : index
      %c0_51 = arith.constant 0 : index
      %c0_52 = arith.constant 0 : index
      %40 = vector.load %arg1[%c0_49, %c0_50, %c0_51, %c0_52] : memref<2x8x8x128xf32, #tpu.memory_space<vmem>>, vector<2x8x8x128xf32>
      %c0_53 = arith.constant 0 : index
      %c1_54 = arith.constant 1 : index
      %c1_55 = arith.constant 1 : index
      %c0_56 = arith.constant 0 : index
      %41 = vector.load %arg9[%c0_53, %c1_54, %c1_55, %c0_56] : memref<2x10x10x128xf32, #tpu.memory_space<vmem>>, vector<2x8x8x128xf32>
      tpu.vector_store %arg9[%c0_53, %c1_54, %c1_55, %c0_56], %40 {strides = array<i32>} : memref<2x10x10x128xf32, #tpu.memory_space<vmem>>, vector<2x8x8x128xf32>,
    } else {
    }
    %c0 = arith.constant 0 : index
    %c0_1 = arith.constant 0 : index
    %c0_2 = arith.constant 0 : index
    %c0_3 = arith.constant 0 : index
    %3 = vector.load %arg9[%c0, %c0_1, %c0_2, %c0_3] : memref<2x10x10x128xf32, #tpu.memory_space<vmem>>, vector<2x8x8x128xf32>
    %4 = vector.shape_cast %3 : vector<2x8x8x128xf32> to vector<128x128xf32>
    %c0_4 = arith.constant 0 : index
    %c0_5 = arith.constant 0 : index
    %c1 = arith.constant 1 : index
    %c0_6 = arith.constant 0 : index
    %5 = vector.load %arg9[%c0_4, %c0_5, %c1, %c0_6] : memref<2x10x10x128xf32, #tpu.memory_space<vmem>>, vector<2x8x8x128xf32>
    %6 = vector.shape_cast %5 : vector<2x8x8x128xf32> to vector<128x128xf32>
    %c0_7 = arith.constant 0 : index
    %c0_8 = arith.constant 0 : index
    %c2 = arith.constant 2 : index
    %c0_9 = arith.constant 0 : index
    %7 = vector.load %arg9[%c0_7, %c0_8, %c2, %c0_9] : memref<2x10x10x128xf32, #tpu.memory_space<vmem>>, vector<2x8x8x128xf32>
    %8 = vector.shape_cast %7 : vector<2x8x8x128xf32> to vector<128x128xf32>
    %c0_10 = arith.constant 0 : index
    %c1_11 = arith.constant 1 : index
    %c0_12 = arith.constant 0 : index
    %c0_13 = arith.constant 0 : index
    %9 = vector.load %arg9[%c0_10, %c1_11, %c0_12, %c0_13] : memref<2x10x10x128xf32, #tpu.memory_space<vmem>>, vector<2x8x8x128xf32>
    %10 = vector.shape_cast %9 : vector<2x8x8x128xf32> to vector<128x128xf32>
    %c0_14 = arith.constant 0 : index
    %c1_15 = arith.constant 1 : index
    %c1_16 = arith.constant 1 : index
    %c0_17 = arith.constant 0 : index
    %11 = vector.load %arg9[%c0_14, %c1_15, %c1_16, %c0_17] : memref<2x10x10x128xf32, #tpu.memory_space<vmem>>, vector<2x8x8x128xf32>
    %12 = vector.shape_cast %11 : vector<2x8x8x128xf32> to vector<128x128xf32>
    %c0_18 = arith.constant 0 : index
    %c1_19 = arith.constant 1 : index
    %c2_20 = arith.constant 2 : index
    %c0_21 = arith.constant 0 : index
    %13 = vector.load %arg9[%c0_18, %c1_19, %c2_20, %c0_21] : memref<2x10x10x128xf32, #tpu.memory_space<vmem>>, vector<2x8x8x128xf32>
    %14 = vector.shape_cast %13 : vector<2x8x8x128xf32> to vector<128x128xf32>
    %c0_22 = arith.constant 0 : index
    %c2_23 = arith.constant 2 : index
    %c0_24 = arith.constant 0 : index
    %c0_25 = arith.constant 0 : index
    %15 = vector.load %arg9[%c0_22, %c2_23, %c0_24, %c0_25] : memref<2x10x10x128xf32, #tpu.memory_space<vmem>>, vector<2x8x8x128xf32>
    %16 = vector.shape_cast %15 : vector<2x8x8x128xf32> to vector<128x128xf32>
    %c0_26 = arith.constant 0 : index
    %c2_27 = arith.constant 2 : index
    %c1_28 = arith.constant 1 : index
    %c0_29 = arith.constant 0 : index
    %17 = vector.load %arg9[%c0_26, %c2_27, %c1_28, %c0_29] : memref<2x10x10x128xf32, #tpu.memory_space<vmem>>, vector<2x8x8x128xf32>
    %18 = vector.shape_cast %17 : vector<2x8x8x128xf32> to vector<128x128xf32>
    %c0_30 = arith.constant 0 : index
    %c2_31 = arith.constant 2 : index
    %c2_32 = arith.constant 2 : index
    %c0_33 = arith.constant 0 : index
    %19 = vector.load %arg9[%c0_30, %c2_31, %c2_32, %c0_33] : memref<2x10x10x128xf32, #tpu.memory_space<vmem>>, vector<2x8x8x128xf32>
    %20 = vector.shape_cast %19 : vector<2x8x8x128xf32> to vector<128x128xf32>
    %21 = tpu.concatenate %4, %6, %8, %10, %12, %14, %16, %18, %20 in 1 : vector<128x128xf32>, vector<128x128xf32>, vector<128x128xf32>, vector<128x128xf32>, vector<128x128xf32>, vector<128x128xf32>, vector<128x128xf32>, vector<128x128xf32>, vector<128x128xf32> -> vector<128x1152xf32>
    %22 = arith.truncf %21 : vector<128x1152xf32> to vector<128x1152xbf16>
    %c0_34 = arith.constant 0 : index
    %c0_35 = arith.constant 0 : index
    %c0_36 = arith.constant 0 : index
    %23 = vector.load %arg2[%c0_34, %c0_35, %c0_36] : memref<1x1152x128xbf16, #tpu.memory_space<vmem>>, vector<1x1152x128xbf16>
    %24 = vector.shape_cast %23 : vector<1x1152x128xbf16> to vector<1152x128xbf16>
    %cst = arith.constant dense<0.000000e+00> : vector<128x128xf32>
    %25 = tpu.matmul %22, %24, %cst {dimension_numbers = #tpu.dot_dimension_numbers<[1], [0], [0], [1], [0, 0, 1, 1], [], []>} : vector<128x1152xbf16>, vector<1152x128xbf16>, vector<128x128xf32> -> vector<128x128xf32>
    %c0_37 = arith.constant 0 : index
    %c0_38 = arith.constant 0 : index
    %c0_39 = arith.constant 0 : index
    %26 = vector.load %arg3[%c0_37, %c0_38, %c0_39] : memref<1x1x128xf32, #tpu.memory_space<vmem>>, vector<1x1x128xf32>
    %27 = vector.shape_cast %26 : vector<1x1x128xf32> to vector<1x128xf32>
    %28 = vector.broadcast %27 : vector<1x128xf32> to vector<128x128xf32>
    %29 = arith.addf %25, %28 : vector<128x128xf32>
    %cst_40 = arith.constant 0.000000e+00 : f32
    %30 = vector.broadcast %cst_40 : f32 to vector<128x128xf32>
    %31 = arith.maximumf %29, %30 : vector<128x128xf32>
    %c7_i32 = arith.constant 7 : i32
    %32 = arith.cmpi slt, %arg0, %c7_i32 : i32
    %33 = arith.extui %32 : i1 to i32
    %c0_i32_41 = arith.constant 0 : i32
    %34 = arith.cmpi ne, %33, %c0_i32_41 : i32
    scf.if %34 {
      %38 = vector.shape_cast %31 : vector<128x128xf32> to vector<2x8x8x128xf32>
      %c0_44 = arith.constant 0 : index
      %c1_45 = arith.constant 1 : index
      %c1_46 = arith.constant 1 : index
      %c0_47 = arith.constant 0 : index
      %39 = vector.load %arg9[%c0_44, %c1_45, %c1_46, %c0_47] : memref<2x10x10x128xf32, #tpu.memory_space<vmem>>, vector<2x8x8x128xf32>
      tpu.vector_store %arg9[%c0_44, %c1_45, %c1_46, %c0_47], %38 {strides = array<i32>} : memref<2x10x10x128xf32, #tpu.memory_space<vmem>>, vector<2x8x8x128xf32>,
    } else {
    }
    %c7_i32_42 = arith.constant 7 : i32
    %35 = arith.cmpi eq, %arg0, %c7_i32_42 : i32
    %36 = arith.extui %35 : i1 to i32
    %c0_i32_43 = arith.constant 0 : i32
    %37 = arith.cmpi ne, %36, %c0_i32_43 : i32
    scf.if %37 {
      %38 = vector.shape_cast %31 : vector<128x128xf32> to vector<2x64x128xf32>
      %c0_44 = arith.constant 0 : index
      %c0_45 = arith.constant 0 : index
      %39 = vector.load %arg4[%c0_44, %c0_45] : memref<1x128xf32, #tpu.memory_space<vmem>>, vector<1x128xf32>
      %40 = vector.shape_cast %39 : vector<1x128xf32> to vector<1x1x128xf32>
      %41 = vector.broadcast %40 : vector<1x1x128xf32> to vector<2x64x128xf32>
      %42 = arith.mulf %38, %41 : vector<2x64x128xf32>
      %cst_46 = arith.constant dense<0.000000e+00> : vector<2x64xf32>
      %43 = vector.multi_reduction <add>, %42, %cst_46 [2] : vector<2x64x128xf32> to vector<2x64xf32>
      %c0_47 = arith.constant 0 : index
      %c0_48 = arith.constant 0 : index
      %44 = vector.load %arg5[%c0_47, %c0_48] : memref<1x1xf32, #tpu.memory_space<vmem>>, vector<1x1xf32>
      %45 = vector.broadcast %44 : vector<1x1xf32> to vector<2x64xf32>
      %46 = arith.addf %43, %45 : vector<2x64xf32>
      %c0_49 = arith.constant 0 : index
      %c0_50 = arith.constant 0 : index
      %47 = vector.load %arg6[%c0_49, %c0_50] : memref<64x64xf32, #tpu.memory_space<vmem>>, vector<64x64xf32>
      %cst_51 = arith.constant dense<0.000000e+00> : vector<2x64xf32>
      %48 = tpu.matmul %46, %47, %cst_51 {dimension_numbers = #tpu.dot_dimension_numbers<[1], [0], [0], [1], [0, 0, 1, 1], [], []>} : vector<2x64xf32>, vector<64x64xf32>, vector<2x64xf32> -> vector<2x64xf32>
      %c0_52 = arith.constant 0 : index
      %c0_53 = arith.constant 0 : index
      %49 = vector.load %arg7[%c0_52, %c0_53] : memref<1x64xf32, #tpu.memory_space<vmem>>, vector<1x64xf32>
      %50 = vector.broadcast %49 : vector<1x64xf32> to vector<2x64xf32>
      %51 = arith.addf %48, %50 : vector<2x64xf32>
      %c0_54 = arith.constant 0 : index
      %c0_55 = arith.constant 0 : index
      %52 = vector.load %arg8[%c0_54, %c0_55] : memref<2x64xf32, #tpu.memory_space<vmem>>, vector<2x64xf32>
      tpu.vector_store %arg8[%c0_54, %c0_55], %51 {strides = array<i32>} : memref<2x64xf32, #tpu.memory_space<vmem>>, vector<2x64xf32>,
    } else {
    }
    return
  }
  func.func @transform_0(%arg0: i32) -> (i32, i32, i32, i32) {
    %c0_i32 = arith.constant 0 : i32
    %c0_i32_0 = arith.constant 0 : i32
    %c0_i32_1 = arith.constant 0 : i32
    %c0_i32_2 = arith.constant 0 : i32
    %c0_i32_3 = arith.constant 0 : i32
    return %c0_i32, %c0_i32_0, %c0_i32_1, %c0_i32_2 : i32, i32, i32, i32
  }
  func.func @transform_1(%arg0: i32) -> (i32, i32, i32) {
    %c0_i32 = arith.constant 0 : i32
    %c0_i32_0 = arith.constant 0 : i32
    %c0_i32_1 = arith.constant 0 : i32
    return %arg0, %c0_i32, %c0_i32_0 : i32, i32, i32
  }
  func.func @transform_2(%arg0: i32) -> (i32, i32, i32) {
    %c0_i32 = arith.constant 0 : i32
    %c0_i32_0 = arith.constant 0 : i32
    %c0_i32_1 = arith.constant 0 : i32
    return %arg0, %c0_i32, %c0_i32_0 : i32, i32, i32
  }
  func.func @transform_3(%arg0: i32) -> (i32, i32) {
    %c0_i32 = arith.constant 0 : i32
    %c0_i32_0 = arith.constant 0 : i32
    %c0_i32_1 = arith.constant 0 : i32
    return %c0_i32, %c0_i32_0 : i32, i32
  }
  func.func @transform_4(%arg0: i32) -> (i32, i32) {
    %c0_i32 = arith.constant 0 : i32
    %c0_i32_0 = arith.constant 0 : i32
    %c0_i32_1 = arith.constant 0 : i32
    return %c0_i32, %c0_i32_0 : i32, i32
  }
  func.func @transform_5(%arg0: i32) -> (i32, i32) {
    %c0_i32 = arith.constant 0 : i32
    %c0_i32_0 = arith.constant 0 : i32
    %c0_i32_1 = arith.constant 0 : i32
    return %c0_i32, %c0_i32_0 : i32, i32
  }
  func.func @transform_6(%arg0: i32) -> (i32, i32) {
    %c0_i32 = arith.constant 0 : i32
    %c0_i32_0 = arith.constant 0 : i32
    %c0_i32_1 = arith.constant 0 : i32
    return %c0_i32, %c0_i32_0 : i32, i32
  }
  func.func @transform_7(%arg0: i32) -> (i32, i32) {
    %c0_i32 = arith.constant 0 : i32
    %c0_i32_0 = arith.constant 0 : i32
    %c0_i32_1 = arith.constant 0 : i32
    return %c0_i32, %c0_i32_0 : i32, i32
  }
}

</mosaic_0001>

<bundles_post_ra>
// kernel: policy_forward.1
= control target key start
LH: loop header
LB: loop body
LE: loop exit
PB: predicated region body
PF: predicated region fallthrough
CT: control target
= control target key end

     0   :  { %s3797_s0 = inlined_call_operand.vmem [shape: f32[2,8,8,128], index: 0, kind: input, shape index: {}]   ;;  %s3798_s1 = inlined_call_operand.hbm [shape: bf16[8,1152,128], index: 1, kind: input, shape index: {}]   ;;  %s3799_s2 = inlined_call_operand.hbm [shape: f32[8,1,128], index: 2, kind: input, shape index: {}]   ;;  %s3800_s3 = inlined_call_operand.hbm [shape: f32[1,128], index: 3, kind: input, shape index: {}]   ;;  %s3801_s4 = inlined_call_operand.<no memory space> [shape: f32[1,1], index: 4, kind: input, shape index: {}]   ;;  %s3802_s5 = inlined_call_operand.hbm [shape: f32[64,64], index: 5, kind: input, shape index: {}]   ;;  %s3803_s6 = inlined_call_operand.hbm [shape: f32[1,64], index: 6, kind: input, shape index: {}]   ;;  %s3804_s7 = inlined_call_operand.hbm [shape: f32[2,64], index: 7, kind: output, shape index: {}]  }
   0x1   :  { %v12_v0 = vstv %s3801_s4 }
   0x2   :  { %13 = vst [vmem:[#allocation3] sm:$0x1] %v12_v0 }
   0x3   :  { %14 = vsyncpa [#allocation5], 0 }
   0x4   :  { %16 = vsyncpa [#allocation5 + $0x1], 0 }
   0x5   :  { %17 = vsyncpa [#allocation8], 0 }
   0x6   :  { %19 = vsyncpa [#allocation8 + $0x1], 0 }
   0x7   :  { %20 = vsyncpa [#allocation11], 0 }
   0x8   :  { %21 = vsyncpa [#allocation6], 0  ;;  %s3055_s26 = smov 0   ;;  %s3057_s27 = smov 0  }
   0x9   :  { %s3059_s28 = smov 0   ;;  %s3061_s29 = smov 0  }
   0xa LB: > { %s3074_s4 = sadd.s32 4294967295, %s2995_s29   ;;  %p68_p0 = scmp.ne.s32.totalorder %s2987_s27, %s2983_s26  ;;  %s2995_s29 = sphi %s3061_s29, %s3823_s29   ;;  %s2991_s28 = sphi %s3059_s28, %s3822_s28   ;;  %s2987_s27 = sphi %s3057_s27, %s3821_s27   ;;  %s2983_s26 = sphi %s3055_s26, %s3820_s26  }
   0xb   : > { %p3805_p1 = scmp.eq.s32.totalorder %s3074_s4, 0  ;;  %p2153_p2 = scmp.ge.s32.totalorder %s2995_s29, 1 }
   0xc   : > { %p210_p3 = scmp.lt.s32.totalorder %s2995_s29, 9  ;;  %s2997_s9 = smov [#allocation9]  }
   0xd   : > { %p3083_p5 = por %p3805_p1, %p68_p0  ;;  %s226_s10 = sshll.u32 %s2997_s9, 4  ;;  %s227_s10 = int_to_ptr.vmem [resolvable:$true] %s226_s10 }
   0xe   : > { %p3087_p6 = pnand %p2153_p2, %p210_p3  ;;  %s2998_s11 = smov [#allocation10]  }
   0xf   : > { %s3808_s30 = scalar_select %p3083_p5, 1, 0 }
  0x10   : > { %s3809_s8 = scalar_select %p3087_p6, 1, 0 }
  0x11   : > { %p2631_p7 = pneg %p3087_p6  ;;  %s239_s12 = sshll.u32 %s2998_s11, 4  ;;  %s3099_s12 = int_to_ptr.vmem [resolvable:$true] %s239_s12 }
  0x12   : > { %s2999_s14 = smov [#allocation12]   ;;  %s2775_s18 = scalar_lea.hbm %s3800_s3, 16 }
  0x13   : > { %p3095_p8 = pnand %p2631_p7, %p3805_p1  ;;  %s3101_s15 = sshll.u32 %s2999_s14, 4  ;;  %s254_s15 = int_to_ptr.vmem [resolvable:$true] %s3101_s15 }
  0x14   : > { %p2776_p9 = scmp.ne.s32.totalorder %s3800_s3, %s2775_s18  ;;  %p2782_p13 = scmp.lt.u32.totalorder %s2775_s18, %s3800_s3 }
  0x15   : > { %p3111_p10 = pneg %p3095_p8 }
  0x17   : > { %p2778_p11 = pnand %p3111_p10, %p2776_p9 }
  0x19   : > { %p2779_p12 = pneg %p2778_p11 }
  0x1b   : > { %p2784_p0 = pnand %p2782_p13, %p2779_p12 }
  0x1d   : > { %2787 = shalt.err (!%p2784_p0)
}
  0x1e   : > { %s2788_s24 = scalar_lea.vmem %s227_s10, 16  ;;  %s2795_s25 = scalar_lea.vmem %s227_s10, 32 }
  0x1f   : > { %p2789_p2 = scmp.ne.s32.totalorder %s227_s10, %s2788_s24  ;;  %p2796_p4 = scmp.lt.s32.totalorder %s227_s10, %s227_s10 }
  0x20   : > { %p2797_p1 = scmp.lt.s32.totalorder %s2795_s25, %s2788_s24 }
  0x21   : > { %p2791_p3 = pnand %p2789_p2, %p3111_p10 }
  0x22   : > { %p2798_p5 = por %p2797_p1, %p2796_p4 }
  0x23   : > { %p2792_p7 = pneg %p2791_p3 }
  0x25   : > { %p2799_p6 = pnand %p2798_p5, %p2792_p7 }
  0x27   : > { %2802 = shalt.err (!%p2799_p6)
}
  0x28   : > { %2634 = dma.hbm_to_vmem [thread:$0]  (!%p3095_p8), %s3800_s3, 16, %s227_s10, [#allocation8]  }
  0x29   : > { %s2803_s16 = scalar_lea.hbm %s3802_s5, 1024 }
  0x2a   : > { %p2804_p9 = scmp.ne.s32.totalorder %s3802_s5, %s2803_s16  ;;  %p2810_p4 = scmp.lt.u32.totalorder %s2803_s16, %s3802_s5 }
  0x2c   : > { %p2806_p11 = pnand %p2804_p9, %p3111_p10 }
  0x2e   : > { %p2807_p1 = pneg %p2806_p11 }
  0x30   : > { %p2812_p5 = pnand %p2810_p4, %p2807_p1 }
  0x32   : > { %2815 = shalt.err (!%p2812_p5)
}
  0x33   : > { %s2816_s10 = scalar_lea.vmem %s3099_s12, 1024  ;;  %p2824_p0 = scmp.lt.s32.totalorder %s3099_s12, %s3099_s12 }
  0x34   : > { %p2817_p6 = scmp.ne.s32.totalorder %s3099_s12, %s2816_s10  ;;  %p2825_p2 = scmp.lt.s32.totalorder %s2816_s10, %s2816_s10 }
  0x36   : > { %p2819_p12 = pnand %p2817_p6, %p3111_p10  ;;  %p2826_p3 = por %p2825_p2, %p2824_p0 }
  0x38   : > { %p2820_p13 = pneg %p2819_p12 }
  0x3a   : > { %p2827_p7 = pnand %p2826_p3, %p2820_p13 }
  0x3c   : > { %2830 = shalt.err (!%p2827_p7)
}
  0x3d   : > { %s3000_s22 = smov 128   ;;  %s3001_s23 = smov 8  }
  0x3e   : > { %2637 = dma.hbm_to_vmem [thread:$0]  (!%p3095_p8), %s3802_s5, 1024, %s3099_s12, [#allocation11], %s3000_s22, %s3000_s22, %s3001_s23  }
  0x3f   : > { %s2831_s11 = scalar_lea.hbm %s3803_s6, 16 }
  0x40   : > { %p2832_p9 = scmp.ne.s32.totalorder %s3803_s6, %s2831_s11  ;;  %p2838_p4 = scmp.lt.u32.totalorder %s2831_s11, %s3803_s6 }
  0x42   : > { %p2834_p11 = pnand %p2832_p9, %p3111_p10 }
  0x44   : > { %p2835_p1 = pneg %p2834_p11 }
  0x46   : > { %p2840_p5 = pnand %p2838_p4, %p2835_p1 }
  0x48   : > { %2843 = shalt.err (!%p2840_p5)
}
  0x49   : > { %s2844_s19 = scalar_lea.vmem %s254_s15, 16  ;;  %s2851_s12 = scalar_lea.vmem %s254_s15, 32 }
  0x4a   : > { %p2845_p6 = scmp.ne.s32.totalorder %s254_s15, %s2844_s19  ;;  %p2852_p0 = scmp.lt.s32.totalorder %s254_s15, %s254_s15 }
  0x4b   : > { %p2853_p2 = scmp.lt.s32.totalorder %s2851_s12, %s2844_s19 }
  0x4c   : > { %p2847_p12 = pnand %p2845_p6, %p3111_p10 }
  0x4d   : > { %p2854_p3 = por %p2853_p2, %p2852_p0 }
  0x4e   : > { %p2848_p13 = pneg %p2847_p12 }
  0x50   : > { %p2855_p7 = pnand %p2854_p3, %p2848_p13 }
  0x52   : > { %2858 = shalt.err (!%p2855_p7)
}
  0x53   : > { %2640 = dma.hbm_to_vmem [thread:$0]  (!%p3095_p8), %s3803_s6, 16, %s254_s15, [#allocation11]  }
  0x54   : > { %s3170_s21 = sadd.s32 1, %s2995_s29   ;;  %s55_s13 = sadd.s32 1, %s2991_s28 }
  0x55   : > { %s52_s22 = ssub.s32 %s2995_s29, %s3170_s21  ;;  %p62_p9 = scmp.ne.s32.totalorder %s2991_s28, %s2987_s27 }
  0x56   : > { %p53_p10 = scmp.eq.s32.totalorder %s52_s22, 0  ;;  %p63_p11 = scmp.eq.s32.totalorder %s2995_s29, 0 }
  0x57   : > { %p2651_p1 = scmp.lt.s32.totalorder %s2995_s29, 8  ;;  %s3183_s24 = sand.u32 1, %s2991_s28  }
  0x58   : > { %s3180_s23 = scalar_select %p53_p10, %s2991_s28, %s55_s13  }
  0x59   : > { %p64_p4 = por %p63_p11, %p62_p9  ;;  %s2608_s25 = smul.u32 576, %s3183_s24 }
  0x5a   : > { %s2609_s26 = smul.u32 9216, %s2995_s29  ;;  %s285_s18 = sand.u32 1, %s2995_s29  }
  0x5b   : > { %p3187_p8 = pnand %p2651_p1, %p64_p4  ;;  %s268_s16 = scalar_lea.vmem [#allocation4], %s2608_s25 }
  0x5c   : > { %s3194_s14 = scalar_lea.hbm %s3798_s1, %s2609_s26  ;;  %s275_s17 = sshll.u32 %s268_s16, 4  ;;  %s3196_s17 = int_to_ptr.vmem [resolvable:$true] %s275_s17 }
  0x5d   : > { %s265_s19 = scalar_lea.sflag [#allocation5], %s3183_s24  ;;  %s2859_s12 = scalar_lea.hbm %s3194_s14, 9216 }
  0x5e   : > { %p2860_p5 = scmp.ne.s32.totalorder %s3194_s14, %s2859_s12  ;;  %p2861_p6 = pneg %p3187_p8 }
  0x5f   : > { %s2864_s22 = scalar_lea.hbm %s3798_s1, 73728  ;;  %p2865_p0 = scmp.lt.u32.totalorder %s3194_s14, %s3798_s1 }
  0x60   : > { %p2862_p12 = pnand %p2861_p6, %p2860_p5  ;;  %p2866_p2 = scmp.lt.u32.totalorder %s2864_s22, %s2859_s12 }
  0x61   : > { %p2868_p7 = scmp.lt.u32.totalorder %s2859_s12, %s3194_s14 }
  0x62   : > { %p2863_p13 = pneg %p2862_p12  ;;  %p2867_p3 = por %p2866_p2, %p2865_p0 }
  0x64   : > { %p2869_p10 = por %p2868_p7, %p2867_p3 }
  0x66   : > { %p2870_p9 = pnand %p2869_p10, %p2863_p13 }
  0x68   : > { %2873 = shalt.err (!%p2870_p9)
}
  0x69   : > { %s2874_s25 = scalar_lea.vmem %s3196_s17, 9216  ;;  %s3002_s9 = smov [#allocation4]  }
  0x6a   : > { %p2875_p11 = scmp.ne.s32.totalorder %s3196_s17, %s2874_s25  ;;  %s2879_s11 = sshll.u32 %s3002_s9, 4  ;;  %s2880_s11 = int_to_ptr.vmem [resolvable:$false] %s2879_s11 }
  0x6b   : > { %s2881_s16 = scalar_lea.vmem %s2880_s11, 18432  ;;  %p2882_p5 = scmp.lt.s32.totalorder %s3196_s17, %s2880_s11 }
  0x6c   : > { %p2877_p1 = pnand %p2875_p11, %p2861_p6  ;;  %p2883_p12 = scmp.lt.s32.totalorder %s2881_s16, %s2874_s25 }
  0x6e   : > { %p2878_p4 = pneg %p2877_p1  ;;  %p2884_p0 = por %p2883_p12, %p2882_p5 }
  0x70   : > { %p2885_p2 = pnand %p2884_p0, %p2878_p4 }
  0x72   : > { %2888 = shalt.err (!%p2885_p2)
}
  0x73   : > { %s3003_s12 = smov 64   ;;  %s3004_s20 = smov 4  }
  0x74   : > { %2644 = dma.hbm_to_vmem [thread:$0]  (!%p3187_p8), %s3194_s14, 9216, %s3196_s17, %s265_s19, %s3003_s12, %s3003_s12, %s3004_s20  }
  0x75   : > { %s2159_s10 = sshll.u32 %s2995_s29, 4  ;;  %s288_s22 = scalar_lea.vmem [#allocation7], %s3183_s24 }
  0x76   : > { %s295_s13 = sshll.u32 %s288_s22, 4  ;;  %s3232_s9 = scalar_lea.hbm %s3799_s2, %s2159_s10  ;;  %s296_s13 = int_to_ptr.vmem [resolvable:$true] %s295_s13 }
  0x77   : > { %s286_s11 = scalar_lea.sflag [#allocation8], %s285_s18  ;;  %s2889_s16 = scalar_lea.hbm %s3232_s9, 16 }
  0x78   : > { %p2890_p13 = scmp.ne.s32.totalorder %s3232_s9, %s2889_s16  ;;  %s2894_s17 = scalar_lea.hbm %s3799_s2, 128 }
  0x79   : > { %p2895_p10 = scmp.lt.u32.totalorder %s3232_s9, %s3799_s2  ;;  %p2896_p9 = scmp.lt.u32.totalorder %s2894_s17, %s2889_s16 }
  0x7a   : > { %p2892_p3 = pnand %p2890_p13, %p2861_p6  ;;  %p2898_p1 = scmp.lt.u32.totalorder %s2889_s16, %s3232_s9 }
  0x7b   : > { %p2897_p11 = por %p2896_p9, %p2895_p10 }
  0x7c   : > { %p2893_p7 = pneg %p2892_p3 }
  0x7d   : > { %p2899_p4 = por %p2898_p1, %p2897_p11 }
  0x7f   : > { %p2900_p5 = pnand %p2899_p4, %p2893_p7 }
  0x81   : > { %2903 = shalt.err (!%p2900_p5)
}
  0x82   : > { %s2904_s29 = scalar_lea.vmem %s296_s13, 16  ;;  %s3005_s18 = smov [#allocation7]  }
  0x83   : > { %p2905_p12 = scmp.ne.s32.totalorder %s296_s13, %s2904_s29  ;;  %s2909_s20 = sshll.u32 %s3005_s18, 4  ;;  %s2910_s20 = int_to_ptr.vmem [resolvable:$false] %s2909_s20 }
  0x84   : > { %s2911_s10 = scalar_lea.vmem %s2910_s20, 32  ;;  %p2912_p13 = scmp.lt.s32.totalorder %s296_s13, %s2910_s20 }
  0x85   : > { %p2907_p0 = pnand %p2905_p12, %p2861_p6  ;;  %p2913_p3 = scmp.lt.s32.totalorder %s2911_s10, %s2904_s29 }
  0x87   : > { %p2908_p2 = pneg %p2907_p0  ;;  %p2914_p9 = por %p2913_p3, %p2912_p13 }
  0x89   : > { %p2915_p10 = pnand %p2914_p9, %p2908_p2 }
  0x8b   : > { %2918 = shalt.err (!%p2915_p10)
}
  0x8c   : > { %2647 = dma.hbm_to_vmem [thread:$0]  (!%p3187_p8), %s3232_s9, 16, %s296_s13, %s286_s11  }
  0x8d   : > { %p3813_p7 = scmp.ne.s32.totalorder %s3809_s8, 0 }
  0x8e   : > { %s3258_s22 = sand.u32 (!%p3813_p7), 1, %s2987_s27   ;;  %p3814_p6 = scmp.ne.s32.totalorder (!%p3813_p7), %s3808_s30, 0 }
  0x8f   : > { %304 = sbr.rel (%p3813_p7) target bundleno = 1018 (0x3fa), region = 48  ;;  %s307_s25 = scalar_lea.sflag (!%p3813_p7), [#allocation5], %s3258_s22 }
  0x90   : > { %s2610_s26 = smul.u32 (!%p3813_p7), 576, %s3258_s22 }
  0x92   : > { %s3262_s16 = scalar_lea.vmem (!%p3813_p7), [#allocation4], %s2610_s26 }
  0x96   : > { %2962 = dma.done.wait (%p3814_p6), %s307_s25, 9216  }
  0x97   : > { %2964 = vsyncadd (%p3814_p6), %s307_s25, 4294958080  ;;  %s315_s8 = sand.u32 1, %s3074_s4   ;;  %s318_s13 = scalar_lea.vmem [#allocation7], %s3258_s22 }
  0x98   : > { %s316_s15 = scalar_lea.sflag [#allocation8], %s315_s8 }
  0x99   : > { %2966 = dma.done.wait (%p3814_p6), %s316_s15, 16  }
  0x9a   : > { %2968 = vsyncadd (%p3814_p6), %s316_s15, 4294967280  ;;  %p3815_p8 = scmp.eq.s32.totalorder %s3074_s4, 0 }
  0x9c   : > { %2970 = dma.done.wait (%p3815_p8), [#allocation8], 16   ;;  %p3816_p11 = pmov %p3815_p8 }
  0x9d   : > { %p3817_p1 = pmov %p3815_p8 }
  0x9e   : > { %2972 = vsyncadd (%p3816_p11), [#allocation8], 4294967280 }
  0x9f   : > { %2974 = dma.done.wait (%p3817_p1), [#allocation11], 1040   ;;  %p3818_p4 = pmov %p3817_p1 }
  0xa0   : > { %p3819_p5 = scmp.ne.s32.totalorder %s3074_s4, 0 }
  0xa1   : > { %2976 = vsyncadd (%p3818_p4), [#allocation11], 4294966256  ;;  %v405_v1 = vld [vmem:[%s3797_s0] sm:$0xff] (!%p3819_p5)  ;;  %v406_v2 = vld [vmem:[%s3797_s0 + $0x8] sm:$0xff] (!%p3819_p5)  ;;  %v3006_v4 = vmov (!%p3819_p5), 0.0  }
  0xa2   : > { %364 = sbr.rel (%p3819_p5) target bundleno = 190 (0xbe), region = 72  ;;  %v407_v3 = vld [vmem:[%s3797_s0 + $0x10] sm:$0xff] (!%p3819_p5)  ;;  %367 = vst [vmem:[#allocation2 + $0x10] sm:$0xff] (!%p3819_p5), %v3006_v4  ;;  %365 = vst [vmem:[#allocation2] sm:$0xff] (!%p3819_p5), %v3006_v4  ;;  %v408_v5 = vld [vmem:[%s3797_s0 + $0x18] sm:$0xff] (!%p3819_p5) }
  0xa3   : > { %366 = vst [vmem:[#allocation2 + $0x8] sm:$0x3] (!%p3819_p5), %v3006_v4  ;;  %368 = vst [vmem:[#allocation2 + $0x18] sm:$0x3] (!%p3819_p5), %v3006_v4  ;;  %v409_v6 = vld [vmem:[%s3797_s0 + $0x20] sm:$0xff] (!%p3819_p5)  ;;  %v410_v7 = vld [vmem:[%s3797_s0 + $0x28] sm:$0xff] (!%p3819_p5) }
  0xa4   : > { %369 = vst [vmem:[#allocation2 + $0x20] sm:$0xff] (!%p3819_p5), %v3006_v4  ;;  %370 = vst [vmem:[#allocation2 + $0x28] sm:$0x3] (!%p3819_p5), %v3006_v4  ;;  %v411_v8 = vld [vmem:[%s3797_s0 + $0x30] sm:$0xff] (!%p3819_p5)  ;;  %v412_v9 = vld [vmem:[%s3797_s0 + $0x38] sm:$0xff] (!%p3819_p5) }
  0xa5   : > { %371 = vst [vmem:[#allocation2 + $0x30] sm:$0xff] (!%p3819_p5), %v3006_v4  ;;  %372 = vst [vmem:[#allocation2 + $0x38] sm:$0x3] (!%p3819_p5), %v3006_v4  ;;  %v413_v10 = vld [vmem:[%s3797_s0 + $0x40] sm:$0xff] (!%p3819_p5)  ;;  %v414_v11 = vld [vmem:[%s3797_s0 + $0x48] sm:$0xff] (!%p3819_p5) }
  0xa6   : > { %373 = vst [vmem:[#allocation2 + $0x40] sm:$0xff] (!%p3819_p5), %v3006_v4  ;;  %374 = vst [vmem:[#allocation2 + $0x48] sm:$0x3] (!%p3819_p5), %v3006_v4  ;;  %v415_v12 = vld [vmem:[%s3797_s0 + $0x50] sm:$0xff] (!%p3819_p5)  ;;  %v416_v13 = vld [vmem:[%s3797_s0 + $0x58] sm:$0xff] (!%p3819_p5) }
  0xa7   : > { %375 = vst [vmem:[#allocation2 + $0x50] sm:$0xff] (!%p3819_p5), %v3006_v4  ;;  %376 = vst [vmem:[#allocation2 + $0x58] sm:$0x3] (!%p3819_p5), %v3006_v4  ;;  %v417_v14 = vld [vmem:[%s3797_s0 + $0x60] sm:$0xff] (!%p3819_p5)  ;;  %v418_v15 = vld [vmem:[%s3797_s0 + $0x68] sm:$0xff] (!%p3819_p5) }
  0xa8   : > { %377 = vst [vmem:[#allocation2 + $0x60] sm:$0xff] (!%p3819_p5), %v3006_v4  ;;  %378 = vst [vmem:[#allocation2 + $0x68] sm:$0x3] (!%p3819_p5), %v3006_v4  ;;  %v419_v16 = vld [vmem:[%s3797_s0 + $0x70] sm:$0xff] (!%p3819_p5)  ;;  %v420_v17 = vld [vmem:[%s3797_s0 + $0x78] sm:$0xff] (!%p3819_p5) }
  0xa9   : > { %379 = vst [vmem:[#allocation2 + $0x70] sm:$0xff] %v3006_v4  ;;  %380 = vst [vmem:[#allocation2 + $0x78] sm:$0x3] %v3006_v4 }
  0xaa   : > { %381 = vst [vmem:[#allocation2 + $0x80] sm:$0xff] %v3006_v4  ;;  %382 = vst [vmem:[#allocation2 + $0x88] sm:$0x3] %v3006_v4 }
  0xab   : > { %383 = vst [vmem:[#allocation2 + $0x90] sm:$0xff] %v3006_v4  ;;  %384 = vst [vmem:[#allocation2 + $0x98] sm:$0x3] %v3006_v4 }
  0xac   : > { %385 = vst [vmem:[#allocation2 + $0xa0] sm:$0xff] %v3006_v4  ;;  %386 = vst [vmem:[#allocation2 + $0xa8] sm:$0x3] %v3006_v4 }
  0xad   : > { %387 = vst [vmem:[#allocation2 + $0xb0] sm:$0xff] %v3006_v4  ;;  %388 = vst [vmem:[#allocation2 + $0xb8] sm:$0x3] %v3006_v4 }
  0xae   : > { %389 = vst [vmem:[#allocation2 + $0xc0] sm:$0xff] %v3006_v4  ;;  %390 = vst [vmem:[#allocation2 + $0xc8] sm:$0x3] %v3006_v4 }
  0xaf   : > { %391 = vst [vmem:[#allocation2 + $0xd0] sm:$0xff] %v3006_v4  ;;  %392 = vst [vmem:[#allocation2 + $0xd8] sm:$0x3] %v3006_v4 }
  0xb0   : > { %393 = vst [vmem:[#allocation2 + $0xe0] sm:$0xff] %v3006_v4  ;;  %394 = vst [vmem:[#allocation2 + $0xe8] sm:$0x3] %v3006_v4 }
  0xb1   : > { %395 = vst [vmem:[#allocation2 + $0xf0] sm:$0xff] %v3006_v4  ;;  %396 = vst [vmem:[#allocation2 + $0xf8] sm:$0x3] %v3006_v4 }
  0xb2   : > { %397 = vst [vmem:[#allocation2 + $0x100] sm:$0xff] %v3006_v4  ;;  %398 = vst [vmem:[#allocation2 + $0x108] sm:$0x3] %v3006_v4 }
  0xb3   : > { %399 = vst [vmem:[#allocation2 + $0x110] sm:$0xff] %v3006_v4  ;;  %400 = vst [vmem:[#allocation2 + $0x118] sm:$0x3] %v3006_v4 }
  0xb4   : > { %401 = vst [vmem:[#allocation2 + $0x120] sm:$0xff] %v3006_v4  ;;  %402 = vst [vmem:[#allocation2 + $0x128] sm:$0x3] %v3006_v4 }
  0xb5   : > { %403 = vst [vmem:[#allocation2 + $0x130] sm:$0xff] %v3006_v4  ;;  %404 = vst [vmem:[#allocation2 + $0x138] sm:$0x3] %v3006_v4 }
  0xb6   : > { %422 = vst [vmem:[#allocation2 + $0x11] sm:$0xff] %v405_v1  ;;  %423 = vst [vmem:[#allocation2 + $0x21] sm:$0xff] %v406_v2 }
  0xb7   : > { %424 = vst [vmem:[#allocation2 + $0x31] sm:$0xff] %v407_v3  ;;  %425 = vst [vmem:[#allocation2 + $0x41] sm:$0xff] %v408_v5 }
  0xb8   : > { %426 = vst [vmem:[#allocation2 + $0x51] sm:$0xff] %v409_v6  ;;  %427 = vst [vmem:[#allocation2 + $0x61] sm:$0xff] %v410_v7 }
  0xb9   : > { %428 = vst [vmem:[#allocation2 + $0x71] sm:$0xff] %v411_v8  ;;  %429 = vst [vmem:[#allocation2 + $0x81] sm:$0xff] %v412_v9 }
  0xba   : > { %430 = vst [vmem:[#allocation2 + $0xb1] sm:$0xff] %v413_v10  ;;  %431 = vst [vmem:[#allocation2 + $0xc1] sm:$0xff] %v414_v11 }
  0xbb   : > { %432 = vst [vmem:[#allocation2 + $0xd1] sm:$0xff] %v415_v12  ;;  %433 = vst [vmem:[#allocation2 + $0xe1] sm:$0xff] %v416_v13 }
  0xbc   : > { %434 = vst [vmem:[#allocation2 + $0xf1] sm:$0xff] %v417_v14  ;;  %435 = vst [vmem:[#allocation2 + $0x101] sm:$0xff] %v418_v15 }
  0xbd   : > { %436 = vst [vmem:[#allocation2 + $0x111] sm:$0xff] %v419_v16  ;;  %437 = vst [vmem:[#allocation2 + $0x121] sm:$0xff] %v420_v17 }
  0xbe PF: > { %v2702_v18 = vld [vmem:[%s3262_s16 + $0x40] sm:$0xff]   ;;  %v2706_v22 = vld [vmem:[%s3262_s16 + $0x48] sm:$0xff]   ;;  %v2710_v26 = vld [vmem:[%s3262_s16 + $0x50] sm:$0xff]   ;;  %p2238_p12 = scmp.ge.s32.totalorder %s3074_s4, 7 }
  0xbf   : > { %v2703_v19 = vld [vmem:[%s3262_s16 + $0xc0] sm:$0xff]   ;;  %2248 = vmatprep.subr.bf16.mxu0 %v2702_v18  ;;  %v2707_v23 = vld [vmem:[%s3262_s16 + $0xc8] sm:$0xff]   ;;  %v2711_v27 = vld [vmem:[%s3262_s16 + $0xd0] sm:$0xff]  }
  0xc0   : > { %v2704_v20 = vld [vmem:[%s3262_s16] sm:$0xff]   ;;  %2312 = vmatprep.subr.bf16.mxu1 %v2703_v19  ;;  %v2708_v24 = vld [vmem:[%s3262_s16 + $0x8] sm:$0xff]   ;;  %v2712_v28 = vld [vmem:[%s3262_s16 + $0x10] sm:$0xff]  }
  0xc1   : > { %v2705_v21 = vld [vmem:[%s3262_s16 + $0x80] sm:$0xff]   ;;  %2249 = vmatpush3.bf16.msra.mxu0 %v2704_v20  ;;  %v2709_v25 = vld [vmem:[%s3262_s16 + $0x88] sm:$0xff]   ;;  %v2713_v29 = vld [vmem:[%s3262_s16 + $0x90] sm:$0xff]  }
  0xc2   : > { %2313 = vmatpush3.bf16.msra.mxu1 %v2705_v21  ;;  %2250 = vmatprep.subr.bf16.mxu0 %v2706_v22  ;;  %v2714_v30 = vld [vmem:[%s3262_s16 + $0x58] sm:$0xff]   ;;  %v2718_v34 = vld [vmem:[%s3262_s16 + $0x60] sm:$0xff]   ;;  %v2722_v38 = vld [vmem:[%s3262_s16 + $0x68] sm:$0xff]  }
  0xc3   : > { %2314 = vmatprep.subr.bf16.mxu1 %v2707_v23  ;;  %v2715_v31 = vld [vmem:[%s3262_s16 + $0xd8] sm:$0xff]   ;;  %v2719_v35 = vld [vmem:[%s3262_s16 + $0xe0] sm:$0xff]   ;;  %v2723_v39 = vld [vmem:[%s3262_s16 + $0xe8] sm:$0xff]  }
  0xc4   : > { %v2716_v32 = vld [vmem:[%s3262_s16 + $0x18] sm:$0xff]   ;;  %v2720_v36 = vld [vmem:[%s3262_s16 + $0x20] sm:$0xff]   ;;  %v2724_v40 = vld [vmem:[%s3262_s16 + $0x28] sm:$0xff]  }
  0xc5   : > { %2251 = vmatpush3.bf16.msra.mxu0 %v2708_v24  ;;  %v2717_v33 = vld [vmem:[%s3262_s16 + $0x98] sm:$0xff]   ;;  %v2721_v37 = vld [vmem:[%s3262_s16 + $0xa0] sm:$0xff]   ;;  %v2725_v41 = vld [vmem:[%s3262_s16 + $0xa8] sm:$0xff]  }
  0xc6   : > { %2315 = vmatpush3.bf16.msra.mxu1 %v2709_v25  ;;  %2252 = vmatprep.subr.bf16.mxu0 %v2710_v26  ;;  %v2726_v42 = vld [vmem:[%s3262_s16 + $0x70] sm:$0xff]   ;;  %v2730_v46 = vld [vmem:[%s3262_s16 + $0x78] sm:$0xff]   ;;  %v454_v50 = vld [vmem:[#allocation2 + $0x1] sm:$0xff] }
  0xc7   : > { %2316 = vmatprep.subr.bf16.mxu1 %v2711_v27  ;;  %v2727_v43 = vld [vmem:[%s3262_s16 + $0xf0] sm:$0xff]   ;;  %v2731_v47 = vld [vmem:[%s3262_s16 + $0xf8] sm:$0xff]   ;;  %v470_v56 = vld [vmem:[#allocation2 + $0x2] sm:$0xff] }
  0xc8   : > { %v2728_v44 = vld [vmem:[%s3262_s16 + $0x30] sm:$0xff]   ;;  %v2732_v48 = vld [vmem:[%s3262_s16 + $0x38] sm:$0xff]   ;;  %v2734_v61 = vld [vmem:[%s3262_s16 + $0x140] sm:$0xff]  }
  0xc9   : > { %2253 = vmatpush3.bf16.msra.mxu0 %v2712_v28  ;;  %v2729_v45 = vld [vmem:[%s3262_s16 + $0xb0] sm:$0xff]   ;;  %v2733_v49 = vld [vmem:[%s3262_s16 + $0xb8] sm:$0xff]   ;;  %v2735_v62 = vld [vmem:[%s3262_s16 + $0x1c0] sm:$0xff]  }
  0xca   : > { %2317 = vmatpush3.bf16.msra.mxu1 %v2713_v29  ;;  %2254 = vmatprep.subr.bf16.mxu0 %v2714_v30  ;;  %v3364_v51 = vld [vmem:[#allocation2 + $0x11] sm:$0xff]  ;;  %v488_v54 = vld [vmem:[#allocation2 + $0x20] sm:$0xff]  ;;  %v2738_v11 = vld [vmem:[%s3262_s16 + $0x148] sm:$0xff]  }
  0xcb   : > { %2318 = vmatprep.subr.bf16.mxu1 %v2715_v31  ;;  %v487_v52 = vld [vmem:[#allocation2 + $0x10] sm:$0xff]  ;;  %v585_v53 = vpack.c.bf16 %v3364_v51, %v454_v50  ;;  %v438_v55 = vld [vmem:[#allocation2] sm:$0xff] }
  0xcc   : > { %v587_v57 = vpack.c.bf16 %v488_v54, %v487_v52  ;;  %v584_v58 = vpack.c.bf16 %v487_v52, %v438_v55  ;;  %v3367_v59 = vld [vmem:[#allocation2 + $0x12] sm:$0xff]  ;;  %v2736_v63 = vld [vmem:[%s3262_s16 + $0x100] sm:$0xff]   ;;  %v2739_v12 = vld [vmem:[%s3262_s16 + $0x1c8] sm:$0xff]  }
  0xcd   : > { %2255 = vmatpush3.bf16.msra.mxu0 %v2716_v32  ;;  %1271 = vmatprep.mubr.bf16.mxu0 %v585_v53  ;;  %v586_v60 = vpack.c.bf16 %v3367_v59, %v470_v56  ;;  %v2737_v0 = vld [vmem:[%s3262_s16 + $0x180] sm:$0xff]   ;;  %v3376_v2 = vld [vmem:[#allocation2 + $0x31] sm:$0xff]  ;;  %v2740_v13 = vld [vmem:[%s3262_s16 + $0x108] sm:$0xff]  }
  0xce   : > { %2319 = vmatpush3.bf16.msra.mxu1 %v2717_v33  ;;  %2256 = vmatprep.subr.bf16.mxu0 %v2718_v34  ;;  %v3374_v1 = vld [vmem:[#allocation2 + $0x21] sm:$0xff]  ;;  %v489_v4 = vld [vmem:[#allocation2 + $0x30] sm:$0xff] }
  0xcf   : > { %2320 = vmatprep.subr.bf16.mxu1 %v2719_v35  ;;  %1368 = vmatprep.mubr.bf16.mxu1 %v587_v57  ;;  %v3380_v3 = vpack.c.bf16 %v3376_v2, %v3374_v1  ;;  %v490_v5 = vld [vmem:[#allocation2 + $0x40] sm:$0xff]  ;;  %v3384_v8 = vpack.c.bf16 %v489_v4, %v488_v54  ;;  %v3386_v9 = vld [vmem:[#allocation2 + $0x32] sm:$0xff]  ;;  %v2741_v14 = vld [vmem:[%s3262_s16 + $0x188] sm:$0xff]  }
  0xd0   : > { %v3382_v6 = vld [vmem:[#allocation2 + $0x22] sm:$0xff]  ;;  %v596_v7 = vpack.c.bf16 %v490_v5, %v489_v4  ;;  %v3400_v16 = vld [vmem:[#allocation2 + $0x51] sm:$0xff] }
  0xd1   : > { %2257 = vmatpush3.bf16.msra.mxu0 %v2720_v36  ;;  %v3391_v10 = vpack.c.bf16 %v3386_v9, %v3382_v6  ;;  %v3398_v15 = vld [vmem:[#allocation2 + $0x41] sm:$0xff]  ;;  %v491_v18 = vld [vmem:[#allocation2 + $0x50] sm:$0xff] }
  0xd2   : > { %2321 = vmatpush3.bf16.msra.mxu1 %v2721_v37  ;;  %2258 = vmatprep.subr.bf16.mxu0 %v2722_v38  ;;  %v3405_v17 = vpack.c.bf16 %v3400_v16, %v3398_v15  ;;  %v492_v19 = vld [vmem:[#allocation2 + $0x60] sm:$0xff]  ;;  %v3409_v22 = vld [vmem:[#allocation2 + $0x52] sm:$0xff]  ;;  %v3413_v24 = vpack.c.bf16 %v491_v18, %v490_v5  ;;  %v2754_v4 = vld [vmem:[%s3262_s16 + $0x168] sm:$0xff]  }
  0xd3   : > { %2322 = vmatprep.subr.bf16.mxu1 %v2723_v39  ;;  %v3407_v20 = vld [vmem:[#allocation2 + $0x42] sm:$0xff]  ;;  %v605_v21 = vpack.c.bf16 %v492_v19, %v491_v18  ;;  %v2742_v23 = vld [vmem:[%s3262_s16 + $0x150] sm:$0xff]   ;;  %v2746_v37 = vld [vmem:[%s3262_s16 + $0x158] sm:$0xff]  }
  0xd4   : > { %v2743_v25 = vld [vmem:[%s3262_s16 + $0x1d0] sm:$0xff]   ;;  %v3418_v26 = vpack.c.bf16 %v3409_v22, %v3407_v20  ;;  %v3422_v29 = vld [vmem:[#allocation2 + $0x61] sm:$0xff]  ;;  %v2747_v38 = vld [vmem:[%s3262_s16 + $0x1d8] sm:$0xff]  }
  0xd5   : > { %2259 = vmatpush3.bf16.msra.mxu0 %v2724_v40  ;;  %v2744_v27 = vld [vmem:[%s3262_s16 + $0x110] sm:$0xff]   ;;  %v3430_v33 = vld [vmem:[#allocation2 + $0x80] sm:$0xff] }
  0xd6   : > { %2323 = vmatpush3.bf16.msra.mxu1 %v2725_v41  ;;  %2260 = vmatprep.subr.bf16.mxu0 %v2726_v42  ;;  %v2745_v28 = vld [vmem:[%s3262_s16 + $0x190] sm:$0xff]   ;;  %v3434_v35 = vld [vmem:[#allocation2 + $0x62] sm:$0xff]  ;;  %v2748_v39 = vld [vmem:[%s3262_s16 + $0x118] sm:$0xff]  }
  0xd7   : > { %2324 = vmatprep.subr.bf16.mxu1 %v2727_v43  ;;  %v3424_v30 = vld [vmem:[#allocation2 + $0x71] sm:$0xff]  ;;  %v2749_v41 = vld [vmem:[%s3262_s16 + $0x198] sm:$0xff]   ;;  %v462_v42 = vld [vmem:[#allocation2 + $0xa1] sm:$0xff] }
  0xd8   : > { %v3428_v31 = vpack.c.bf16 %v3424_v30, %v3422_v29  ;;  %v493_v32 = vld [vmem:[#allocation2 + $0x70] sm:$0xff]  ;;  %v2750_v50 = vld [vmem:[%s3262_s16 + $0x160] sm:$0xff]  }
  0xd9   : > { %2261 = vmatpush3.bf16.msra.mxu0 %v2728_v44  ;;  %v614_v34 = vpack.c.bf16 %v3430_v33, %v493_v32  ;;  %v3436_v36 = vld [vmem:[#allocation2 + $0x72] sm:$0xff]  ;;  %v3443_v40 = vpack.c.bf16 %v493_v32, %v492_v19  ;;  %v478_v52 = vld [vmem:[#allocation2 + $0xa2] sm:$0xff] }
  0xda   : > { %2325 = vmatpush3.bf16.msra.mxu1 %v2729_v45  ;;  %2262 = vmatprep.subr.bf16.mxu0 %v2730_v46  ;;  %v3446_v43 = vld [vmem:[#allocation2 + $0xb1] sm:$0xff]  ;;  %v3450_v44 = vpack.c.bf16 %v3436_v36, %v3434_v35  ;;  %v2751_v54 = vld [vmem:[%s3262_s16 + $0x1e0] sm:$0xff]  }
  0xdb   : > { %2326 = vmatprep.subr.bf16.mxu1 %v2731_v47  ;;  %v621_v45 = vpack.c.bf16 %v3446_v43, %v462_v42  ;;  %v495_v46 = vld [vmem:[#allocation2 + $0xb0] sm:$0xff]  ;;  %v496_v47 = vld [vmem:[#allocation2 + $0xc0] sm:$0xff] }
  0xdc   : > { %v3455_v53 = vld [vmem:[#allocation2 + $0xb2] sm:$0xff]  ;;  %v2752_v55 = vld [vmem:[%s3262_s16 + $0x120] sm:$0xff]  }
  0xdd   : > { %2263 = vmatpush3.bf16.msra.mxu0 %v2732_v48  ;;  %v623_v48 = vpack.c.bf16 %v496_v47, %v495_v46  ;;  %v2753_v56 = vld [vmem:[%s3262_s16 + $0x1a0] sm:$0xff]   ;;  %v3481_v19 = vld [vmem:[#allocation2 + $0xf1] sm:$0xff] }
  0xde   : > { %2327 = vmatpush3.bf16.msra.mxu1 %v2733_v49  ;;  %2376 = vmatprep.subr.bf16.mxu0 %v2734_v61  ;;  %v446_v49 = vld [vmem:[#allocation2 + $0xa0] sm:$0xff]  ;;  %v3500_v42 = vld [vmem:[#allocation2 + $0xf2] sm:$0xff] }
  0xdf   : > { %2440 = vmatprep.subr.bf16.mxu1 %v2735_v62  ;;  %v3461_v57 = vld [vmem:[#allocation2 + $0xc1] sm:$0xff]  ;;  %v620_v62 = vpack.c.bf16 %v495_v46, %v446_v49  ;;  %v3504_v46 = vld [vmem:[#allocation2 + $0x111] sm:$0xff]  ;;  %v2762_v49 = vld [vmem:[%s3262_s16 + $0x178] sm:$0xff]  }
  0xe0   : > { %1272 = vmatmul.mubr.bf16.vlgmr.msra.gmra.mrb[0].mxu0 %v584_v58  ;;  %v3463_v58 = vld [vmem:[#allocation2 + $0xd1] sm:$0xff]  ;;  %v498_v61 = vld [vmem:[#allocation2 + $0xe0] sm:$0xff] }
  0xe1   : > { %1369 = vmatmul.mubr.bf16.vlgmr.msra.gmra.mrb[0].mxu1 %v586_v60  ;;  %2377 = vmatpush3.bf16.msra.mxu0 %v2736_v63  ;;  %v497_v60 = vld [vmem:[#allocation2 + $0xd0] sm:$0xff]  ;;  %v622_v63 = vpack.c.bf16 %v3455_v53, %v478_v52  ;;  %v3479_v18 = vld [vmem:[#allocation2 + $0xe1] sm:$0xff]  ;;  %v2764_v52 = vld [vmem:[%s3262_s16 + $0x138] sm:$0xff]  }
  0xe2   : > { %2441 = vmatpush3.bf16.msra.mxu1 %v2737_v0  ;;  %1279 = vmatprep.mubr.bf16.mxu0 %v3380_v3  ;;  %v3468_v0 = vpack.c.bf16 %v3463_v58, %v3461_v57  ;;  %v632_v5 = vpack.c.bf16 %v498_v61, %v497_v60 }
  0xe3   : > { %1376 = vmatprep.mubr.bf16.mxu1 %v596_v7  ;;  %2378 = vmatprep.subr.bf16.mxu0 %v2738_v11  ;;  %v2755_v7 = vld [vmem:[%s3262_s16 + $0x1e8] sm:$0xff]  }
  0xe4   : > { %2442 = vmatprep.subr.bf16.mxu1 %v2739_v12  ;;  %v2756_v11 = vld [vmem:[%s3262_s16 + $0x128] sm:$0xff]  }
  0xe5   : > { %2379 = vmatpush3.bf16.msra.mxu0 %v2740_v13  ;;  %v3473_v12 = vld [vmem:[#allocation2 + $0xc2] sm:$0xff] }
  0xe6   : > { %2443 = vmatpush3.bf16.msra.mxu1 %v2741_v14  ;;  %2380 = vmatprep.subr.bf16.mxu0 %v2742_v23  ;;  %v2757_v13 = vld [vmem:[%s3262_s16 + $0x1a8] sm:$0xff]   ;;  %v3477_v14 = vld [vmem:[#allocation2 + $0xd2] sm:$0xff]  ;;  %v500_v23 = vld [vmem:[#allocation2 + $0x100] sm:$0xff] }
  0xe7   : > { %2444 = vmatprep.subr.bf16.mxu1 %v2743_v25  ;;  %v2758_v25 = vld [vmem:[%s3262_s16 + $0x170] sm:$0xff]   ;;  %v3489_v32 = vpack.c.bf16 %v3477_v14, %v3473_v12 }
  0xe8   : > { %1280 = vmatmul.mubr.bf16.gmra.mrb[4].mxu0 %v3384_v8 }
  0xe9   : > { %1377 = vmatmul.mubr.bf16.gmra.mrb[4].mxu1 %v3391_v10  ;;  %1287 = vmatprep.mubr.bf16.mxu0 %v3405_v17 }
  0xea   : > { %1384 = vmatprep.mubr.bf16.mxu1 %v605_v21  ;;  %2381 = vmatpush3.bf16.msra.mxu0 %v2744_v27  ;;  %v499_v21 = vld [vmem:[#allocation2 + $0xf0] sm:$0xff]  ;;  %v3484_v27 = vpack.c.bf16 %v497_v60, %v496_v47 }
  0xeb   : > { %2445 = vmatpush3.bf16.msra.mxu1 %v2745_v28  ;;  %2382 = vmatprep.subr.bf16.mxu0 %v2746_v37  ;;  %v2759_v28 = vld [vmem:[%s3262_s16 + $0x1f0] sm:$0xff]  }
  0xec   : > { %2446 = vmatprep.subr.bf16.mxu1 %v2747_v38  ;;  %v2760_v37 = vld [vmem:[%s3262_s16 + $0x130] sm:$0xff]   ;;  %v641_v38 = vpack.c.bf16 %v500_v23, %v499_v21 }
  0xed   : > { %v501_v47 = vld [vmem:[#allocation2 + $0x110] sm:$0xff] }
  0xee   : > { %2383 = vmatpush3.bf16.msra.mxu0 %v2748_v39  ;;  %v2761_v39 = vld [vmem:[%s3262_s16 + $0x1b0] sm:$0xff]  }
  0xef   : > { %2447 = vmatpush3.bf16.msra.mxu1 %v2749_v41  ;;  %2384 = vmatprep.subr.bf16.mxu0 %v2750_v50  ;;  %v3498_v41 = vld [vmem:[#allocation2 + $0xe2] sm:$0xff]  ;;  %v2763_v50 = vld [vmem:[%s3262_s16 + $0x1f8] sm:$0xff]  }
  0xf0   : > { %1288 = vmatmul.mubr.bf16.gmra.mrb[8].mxu0 %v3413_v24  ;;  %2448 = vmatprep.subr.bf16.mxu1 %v2751_v54  ;;  %v3513_v54 = vpack.c.bf16 %v499_v21, %v498_v61  ;;  %v3529_v61 = vld [vmem:[#allocation2 + $0x102] sm:$0xff]  ;;  %v598_v21 = vpack.c.bf16 %v3407_v20, %v3386_v9 }
  0xf1   : > { %1385 = vmatmul.mubr.bf16.gmra.mrb[8].mxu1 %v3418_v26  ;;  %1295 = vmatprep.mubr.bf16.mxu0 %v3428_v31  ;;  %v2770_v9 = vld [vmem:[%s3262_s16 + $0x220] sm:$0xff]  }
  0xf2   : > { %1392 = vmatprep.mubr.bf16.mxu1 %v614_v34  ;;  %2385 = vmatpush3.bf16.msra.mxu0 %v2752_v55  ;;  %v3493_v34 = vpack.c.bf16 %v3481_v19, %v3479_v18  ;;  %v2765_v55 = vld [vmem:[%s3262_s16 + $0x1b8] sm:$0xff]  }
  0xf3   : > { %2449 = vmatpush3.bf16.msra.mxu1 %v2753_v56  ;;  %2386 = vmatprep.subr.bf16.mxu0 %v2754_v4  ;;  %v3518_v56 = vpack.c.bf16 %v3500_v42, %v3498_v41  ;;  %v3531_v4 = vld [vmem:[#allocation2 + $0x112] sm:$0xff] }
  0xf4   : > { %2450 = vmatprep.subr.bf16.mxu1 %v2755_v7  ;;  %v3537_v7 = vpack.c.bf16 %v3531_v4, %v3529_v61 }
  0xf6   : > { %2387 = vmatpush3.bf16.msra.mxu0 %v2756_v11  ;;  %v589_v11 = vpack.c.bf16 %v3382_v6, %v3367_v59  ;;  %v2768_v59 = vld [vmem:[%s3262_s16 + $0x210] sm:$0xff]   ;;  %v3559_v6 = vld [vmem:[#allocation2 + $0x82] sm:$0xff] }
  0xf7   : > { %2451 = vmatpush3.bf16.msra.mxu1 %v2757_v13  ;;  %2388 = vmatprep.subr.bf16.mxu0 %v2758_v25  ;;  %v588_v13 = vpack.c.bf16 %v3374_v1, %v3364_v51  ;;  %v607_v51 = vpack.c.bf16 %v3434_v35, %v3409_v22  ;;  %v2769_v1 = vld [vmem:[%s3262_s16 + $0x218] sm:$0xff]   ;;  %v2771_v22 = vld [vmem:[%s3262_s16 + $0x228] sm:$0xff]   ;;  %v625_v35 = vpack.c.bf16 %v3473_v12, %v3455_v53 }
  0xf8   : > { %1296 = vmatmul.mubr.bf16.gmra.mrb[12].mxu0 %v3443_v40  ;;  %2452 = vmatprep.subr.bf16.mxu1 %v2759_v28  ;;  %v643_v53 = vpack.c.bf16 %v3529_v61, %v3500_v42  ;;  %v583_v28 = vld [vmem:[#allocation2 + $0x132] sm:$0xff] }
  0xf9   : > { %1393 = vmatmul.mubr.bf16.gmra.mrb[12].mxu1 %v3450_v44  ;;  %1303 = vmatprep.mubr.bf16.mxu0 %v621_v45  ;;  %v3502_v45 = vld [vmem:[#allocation2 + $0x101] sm:$0xff] }
  0xfa   : > { %1400 = vmatprep.mubr.bf16.mxu1 %v623_v48  ;;  %2389 = vmatpush3.bf16.msra.mxu0 %v2760_v37  ;;  %v3508_v48 = vld [vmem:[#allocation2 + $0x120] sm:$0xff]  ;;  %v3522_v60 = vpack.c.bf16 %v3504_v46, %v3502_v45  ;;  %v642_v12 = vpack.c.bf16 %v3502_v45, %v3481_v19  ;;  %v575_v19 = vld [vmem:[#allocation2 + $0x92] sm:$0xff] }
  0xfb   : > { %2453 = vmatpush3.bf16.msra.mxu1 %v2761_v39  ;;  %2390 = vmatprep.subr.bf16.mxu0 %v2762_v49 }
  0xfc   : > { %2454 = vmatprep.subr.bf16.mxu1 %v2763_v50 }
  0xfe   : > { %2391 = vmatpush3.bf16.msra.mxu0 %v2764_v52 }
  0xff   : > { %2455 = vmatpush3.bf16.msra.mxu1 %v2765_v55 }
 0x100   : > { %1304 = vmatmul.mubr.bf16.gmra.mrb[16].mxu0 %v620_v62  ;;  %v2766_v62 = vld [vmem:[%s3262_s16 + $0x200] sm:$0xff]  }
 0x101   : > { %1401 = vmatmul.mubr.bf16.gmra.mrb[16].mxu1 %v622_v63  ;;  %1311 = vmatprep.mubr.bf16.mxu0 %v3468_v0  ;;  %v650_v63 = vpack.c.bf16 %v3508_v48, %v501_v47 }
 0x102   : > { %1408 = vmatprep.mubr.bf16.mxu1 %v632_v5  ;;  %2529 = vmatprep.subr.bf16.mxu0 %v2766_v62  ;;  %v3533_v5 = vpack.c.bf16 %v501_v47, %v500_v23  ;;  %v2767_v23 = vld [vmem:[%s3262_s16 + $0x208] sm:$0xff]  }
 0x103   : > { %2592 = vmatprep.subr.bf16.mxu1 %v2766_v62 }
 0x108   : > { %1312 = vmatmul.mubr.bf16.gmra.mrb[20].mxu0 %v3484_v27 }
 0x109   : > { %1409 = vmatmul.mubr.bf16.gmra.mrb[20].mxu1 %v3489_v32  ;;  %1319 = vmatprep.mubr.bf16.mxu0 %v3493_v34 }
 0x10a   : > { %1416 = vmatprep.mubr.bf16.mxu1 %v641_v38 }
 0x110   : > { %1320 = vmatmul.mubr.bf16.gmra.mrb[24].mxu0 %v3513_v54 }
 0x111   : > { %1417 = vmatmul.mubr.bf16.gmra.mrb[24].mxu1 %v3518_v56  ;;  %1327 = vmatprep.mubr.bf16.mxu0 %v3522_v60 }
 0x112   : > { %1424 = vmatprep.mubr.bf16.mxu1 %v650_v63 }
 0x118   : > { %1328 = vmatmul.mubr.bf16.gmra.mrb[28].mxu0 %v3533_v5 }
 0x119   : > { %1425 = vmatmul.mubr.bf16.gmra.mrb[28].mxu1 %v3537_v7  ;;  %1465 = vmatprep.mubr.bf16.mxu0 %v589_v11 }
 0x11a   : > { %1562 = vmatprep.mubr.bf16.mxu1 %v3380_v3  ;;  %v597_v3 = vpack.c.bf16 %v3398_v15, %v3376_v2  ;;  %v558_v2 = vld [vmem:[#allocation2 + $0x81] sm:$0xff]  ;;  %v606_v15 = vpack.c.bf16 %v3422_v29, %v3400_v16  ;;  %v2772_v16 = vld [vmem:[%s3262_s16 + $0x230] sm:$0xff]  }
 0x11b   : > { %v615_v29 = vpack.c.bf16 %v558_v2, %v3424_v30  ;;  %v624_v30 = vpack.c.bf16 %v3461_v57, %v3446_v43  ;;  %v534_v43 = vld [vmem:[#allocation2 + $0x122] sm:$0xff] }
 0x11c   : > { %v566_v57 = vld [vmem:[#allocation2 + $0x121] sm:$0xff]  ;;  %v655_v37 = vpack.c.bf16 %v583_v28, %v534_v43 }
 0x120   : > { %1466 = vmatmul.mubr.bf16.vlgmr.msra.gmra.mrb[32].mxu0 %v588_v13 }
 0x121   : > { %1563 = vmatmul.mubr.bf16.vlgmr.msra.gmra.mrb[32].mxu1 %v3384_v8  ;;  %2530 = vmatpush3.bf16.msra.mxu0 %v2766_v62  ;;  %v559_v8 = vld [vmem:[#allocation2 + $0x91] sm:$0xff] }
 0x122   : > { %2600 = vmatpush3.bf16.msra.mxu1 %v2766_v62  ;;  %1473 = vmatprep.mubr.bf16.mxu0 %v598_v21  ;;  %v618_v20 = vpack.c.bf16 %v559_v8, %v558_v2 }
 0x123   : > { %1570 = vmatprep.mubr.bf16.mxu1 %v3405_v17  ;;  %2531 = vmatprep.subr.bf16.mxu0 %v2767_v23  ;;  %v616_v17 = vpack.c.bf16 %v3559_v6, %v3436_v36  ;;  %v2773_v36 = vld [vmem:[%s3262_s16 + $0x238] sm:$0xff]  }
 0x124   : > { %2593 = vmatprep.subr.bf16.mxu1 %v2767_v23 }
 0x125   : > { %2532 = vmatpush3.bf16.msra.mxu0 %v2767_v23 }
 0x126   : > { %2601 = vmatpush3.bf16.msra.mxu1 %v2767_v23  ;;  %2533 = vmatprep.subr.bf16.mxu0 %v2768_v59 }
 0x127   : > { %2594 = vmatprep.subr.bf16.mxu1 %v2768_v59 }
 0x128   : > { %1474 = vmatmul.mubr.bf16.gmra.mrb[36].mxu0 %v597_v3 }
 0x129   : > { %1571 = vmatmul.mubr.bf16.gmra.mrb[36].mxu1 %v3413_v24  ;;  %1481 = vmatprep.mubr.bf16.mxu0 %v607_v51  ;;  %v543_v24 = vld [vmem:[#allocation2 + $0x90] sm:$0xff] }
 0x12a   : > { %1578 = vmatprep.mubr.bf16.mxu1 %v3428_v31  ;;  %2534 = vmatpush3.bf16.msra.mxu0 %v2768_v59  ;;  %v617_v31 = vpack.c.bf16 %v543_v24, %v3430_v33  ;;  %v634_v33 = vpack.c.bf16 %v3498_v41, %v3477_v14  ;;  %v652_v14 = vpack.c.bf16 %v534_v43, %v3531_v4 }
 0x12b   : > { %2602 = vmatpush3.bf16.msra.mxu1 %v2768_v59  ;;  %2535 = vmatprep.subr.bf16.mxu0 %v2769_v1 }
 0x12c   : > { %2595 = vmatprep.subr.bf16.mxu1 %v2769_v1 }
 0x12e   : > { %2536 = vmatpush3.bf16.msra.mxu0 %v2769_v1 }
 0x12f   : > { %2603 = vmatpush3.bf16.msra.mxu1 %v2769_v1  ;;  %2537 = vmatprep.subr.bf16.mxu0 %v2770_v9 }
 0x130   : > { %1482 = vmatmul.mubr.bf16.gmra.mrb[40].mxu0 %v606_v15  ;;  %2596 = vmatprep.subr.bf16.mxu1 %v2770_v9 }
 0x131   : > { %1579 = vmatmul.mubr.bf16.gmra.mrb[40].mxu1 %v3443_v40  ;;  %1489 = vmatprep.mubr.bf16.mxu0 %v616_v17  ;;  %v633_v40 = vpack.c.bf16 %v3479_v18, %v3463_v58  ;;  %v551_v58 = vld [vmem:[#allocation2 + $0x130] sm:$0xff]  ;;  %v651_v18 = vpack.c.bf16 %v566_v57, %v3504_v46 }
 0x132   : > { %1586 = vmatprep.mubr.bf16.mxu1 %v618_v20  ;;  %2538 = vmatpush3.bf16.msra.mxu0 %v2770_v9 }
 0x133   : > { %2604 = vmatpush3.bf16.msra.mxu1 %v2770_v9  ;;  %2539 = vmatprep.subr.bf16.mxu0 %v2771_v22 }
 0x134   : > { %2597 = vmatprep.subr.bf16.mxu1 %v2771_v22 }
 0x136   : > { %2540 = vmatpush3.bf16.msra.mxu0 %v2771_v22 }
 0x137   : > { %2605 = vmatpush3.bf16.msra.mxu1 %v2771_v22  ;;  %2541 = vmatprep.subr.bf16.mxu0 %v2772_v16 }
 0x138   : > { %1490 = vmatmul.mubr.bf16.gmra.mrb[44].mxu0 %v615_v29  ;;  %2598 = vmatprep.subr.bf16.mxu1 %v2772_v16 }
 0x139   : > { %1587 = vmatmul.mubr.bf16.gmra.mrb[44].mxu1 %v617_v31  ;;  %1497 = vmatprep.mubr.bf16.mxu0 %v625_v35 }
 0x13a   : > { %1594 = vmatprep.mubr.bf16.mxu1 %v3468_v0  ;;  %2542 = vmatpush3.bf16.msra.mxu0 %v2772_v16  ;;  %v567_v0 = vld [vmem:[#allocation2 + $0x131] sm:$0xff] }
 0x13b   : > { %2606 = vmatpush3.bf16.msra.mxu1 %v2772_v16  ;;  %2543 = vmatprep.subr.bf16.mxu0 %v2773_v36  ;;  %v654_v25 = vpack.c.bf16 %v567_v0, %v566_v57 }
 0x13c   : > { %2599 = vmatprep.subr.bf16.mxu1 %v2773_v36 }
 0x13e   : > { %2544 = vmatpush3.bf16.msra.mxu0 %v2773_v36 }
 0x13f   : > { %2607 = vmatpush3.bf16.msra.mxu1 %v2773_v36 }
 0x140   : > { %1498 = vmatmul.mubr.bf16.gmra.mrb[48].mxu0 %v624_v30 }
 0x141   : > { %1595 = vmatmul.mubr.bf16.gmra.mrb[48].mxu1 %v3484_v27  ;;  %1505 = vmatprep.mubr.bf16.mxu0 %v634_v33  ;;  %v653_v27 = vpack.c.bf16 %v551_v58, %v3508_v48 }
 0x142   : > { %1602 = vmatprep.mubr.bf16.mxu1 %v3493_v34  ;;  %v619_v34 = vpack.c.bf16 %v575_v19, %v3559_v6 }
 0x148   : > { %1506 = vmatmul.mubr.bf16.gmra.mrb[52].mxu0 %v633_v40 }
 0x149   : > { %1603 = vmatmul.mubr.bf16.gmra.mrb[52].mxu1 %v3513_v54  ;;  %1513 = vmatprep.mubr.bf16.mxu0 %v643_v53 }
 0x14a   : > { %1610 = vmatprep.mubr.bf16.mxu1 %v3522_v60 }
 0x150   : > { %1514 = vmatmul.mubr.bf16.gmra.mrb[56].mxu0 %v642_v12 }
 0x151   : > { %1611 = vmatmul.mubr.bf16.gmra.mrb[56].mxu1 %v3533_v5  ;;  %1521 = vmatprep.mubr.bf16.mxu0 %v652_v14 }
 0x152   : > { %1618 = vmatprep.mubr.bf16.mxu1 %v654_v25 }
 0x158   : > { %1522 = vmatmul.mubr.bf16.gmra.mrb[60].mxu0 %v651_v18 }
 0x159   : > { %1619 = vmatmul.mubr.bf16.gmra.mrb[60].mxu1 %v653_v27  ;;  %2545 = vmatprep.mubr.bf16.mxu0 %v3391_v10  ;;  %v3602_v10 = vld [vmem:[%s318_s13] ss:$0 sm:$0xff] }
 0x15a   : > { %2553 = vmatprep.mubr.bf16.mxu1 %v3489_v32 }
 0x160   : > { %2546 = vmatmul.mubr.bf16.vlgmr.msra.gmra.mrb[64].mxu0 %v3418_v26 }
 0x161   : > { %2554 = vmatmul.mubr.bf16.vlgmr.msra.gmra.mrb[64].mxu1 %v3518_v56  ;;  %2549 = vmatprep.mubr.bf16.mxu0 %v3450_v44 }
 0x162   : > { %2557 = vmatprep.mubr.bf16.mxu1 %v3537_v7 }
 0x168   : > { %2550 = vmatmul.mubr.bf16.gmra.mrb[68].mxu0 %v619_v34 }
 0x169   : > { %2558 = vmatmul.mubr.bf16.gmra.mrb[68].mxu1 %v655_v37 }
 0x1b3   : > { %v2264_v38 = vpop.f32.mrb[0].mxu0 }
 0x1b4   : > { %v2328_v39 = vpop.f32.mrb[0].mxu1  ;;  %v2265_v32 = vpop.f32.mrb[1].mxu0 }
 0x1b5   : > { %v2266_v26 = vadd.f32 %v2265_v32, %v2264_v38  ;;  %v2329_v41 = vpop.f32.mrb[1].mxu1  ;;  %v2267_v42 = vpop.f32.mrb[2].mxu0 }
 0x1b6   : > { %v2330_v45 = vadd.f32 %v2329_v41, %v2328_v39  ;;  %v2331_v44 = vpop.f32.mrb[2].mxu1  ;;  %v2268_v46 = vpop.f32.mrb[3].mxu0 }
 0x1b7   : > { %v1274_v47 = vadd.f32 %v2266_v26, %v3602_v10  ;;  %v2269_v48 = vadd.f32 %v2268_v46, %v2267_v42  ;;  %v2332_v49 = vpop.f32.mrb[3].mxu1 }
 0x1b8   : > { %v2333_v50 = vadd.f32 %v2332_v49, %v2331_v44 }
 0x1b9   : > { %v3605_v52 = vadd.f32 %v2330_v45, %v1274_v47  ;;  %v1277_v54 = vadd.f32 %v2269_v48, %v3602_v10 }
 0x1bb   : > { %v3608_v55 = vadd.f32 %v2333_v50, %v1277_v54  ;;  %v2270_v56 = vpop.f32.mrb[4].mxu0 }
 0x1bc   : > { %v2334_v60 = vpop.f32.mrb[4].mxu1  ;;  %v2271_v62 = vpop.f32.mrb[5].mxu0 }
 0x1bd   : > { %v2272_v63 = vadd.f32 %v2271_v62, %v2270_v56  ;;  %v2335_v61 = vpop.f32.mrb[5].mxu1  ;;  %v2273_v4 = vpop.f32.mrb[6].mxu0 }
 0x1be   : > { %v2336_v5 = vadd.f32 %v2335_v61, %v2334_v60  ;;  %v2337_v7 = vpop.f32.mrb[6].mxu1  ;;  %v2274_v11 = vpop.f32.mrb[7].mxu0 }
 0x1bf   : > { %v1282_v13 = vadd.f32 %v2272_v63, %v3602_v10  ;;  %v2275_v21 = vadd.f32 %v2274_v11, %v2273_v4  ;;  %v2338_v23 = vpop.f32.mrb[7].mxu1 }
 0x1c0   : > { %v2339_v59 = vadd.f32 %v2338_v23, %v2337_v7 }
 0x1c1   : > { %v3611_v3 = vadd.f32 %v2336_v5, %v1282_v13  ;;  %v1285_v51 = vadd.f32 %v2275_v21, %v3602_v10 }
 0x1c3   : > { %v3614_v1 = vadd.f32 %v2339_v59, %v1285_v51  ;;  %v2276_v6 = vpop.f32.mrb[8].mxu0 }
 0x1c4   : > { %v2340_v2 = vpop.f32.mrb[8].mxu1  ;;  %v2277_v8 = vpop.f32.mrb[9].mxu0 }
 0x1c5   : > { %v2278_v9 = vadd.f32 %v2277_v8, %v2276_v6  ;;  %v2341_v15 = vpop.f32.mrb[9].mxu1  ;;  %v2279_v17 = vpop.f32.mrb[10].mxu0 }
 0x1c6   : > { %v2342_v20 = vadd.f32 %v2341_v15, %v2340_v2  ;;  %v2343_v22 = vpop.f32.mrb[10].mxu1  ;;  %v2280_v24 = vpop.f32.mrb[11].mxu0 }
 0x1c7   : > { %v1290_v16 = vadd.f32 %v2278_v9, %v3602_v10  ;;  %v2281_v29 = vadd.f32 %v2280_v24, %v2279_v17  ;;  %v2344_v31 = vpop.f32.mrb[11].mxu1 }
 0x1c8   : > { %v2345_v35 = vadd.f32 %v2344_v31, %v2343_v22 }
 0x1c9   : > { %v3617_v36 = vadd.f32 %v2342_v20, %v1290_v16  ;;  %v1293_v30 = vadd.f32 %v2281_v29, %v3602_v10 }
 0x1cb   : > { %v3620_v33 = vadd.f32 %v2345_v35, %v1293_v30  ;;  %v2282_v40 = vpop.f32.mrb[12].mxu0 }
 0x1cc   : > { %v2346_v53 = vpop.f32.mrb[12].mxu1  ;;  %v2283_v43 = vpop.f32.mrb[13].mxu0 }
 0x1cd   : > { %v2284_v57 = vadd.f32 %v2283_v43, %v2282_v40  ;;  %v2347_v0 = vpop.f32.mrb[13].mxu1  ;;  %v2285_v12 = vpop.f32.mrb[14].mxu0 }
 0x1ce   : > { %v2348_v14 = vadd.f32 %v2347_v0, %v2346_v53  ;;  %v2349_v25 = vpop.f32.mrb[14].mxu1  ;;  %v2286_v58 = vpop.f32.mrb[15].mxu0 }
 0x1cf   : > { %v1298_v18 = vadd.f32 %v2284_v57, %v3602_v10  ;;  %v2287_v27 = vadd.f32 %v2286_v58, %v2285_v12  ;;  %v2350_v19 = vpop.f32.mrb[15].mxu1 }
 0x1d0   : > { %v2351_v28 = vadd.f32 %v2350_v19, %v2349_v25 }
 0x1d1   : > { %v3623_v34 = vadd.f32 %v2348_v14, %v1298_v18  ;;  %v1301_v37 = vadd.f32 %v2287_v27, %v3602_v10 }
 0x1d3   : > { %v3626_v38 = vadd.f32 %v2351_v28, %v1301_v37  ;;  %v2288_v39 = vpop.f32.mrb[16].mxu0 }
 0x1d4   : > { %v2352_v32 = vpop.f32.mrb[16].mxu1  ;;  %v2289_v26 = vpop.f32.mrb[17].mxu0 }
 0x1d5   : > { %v2290_v41 = vadd.f32 %v2289_v26, %v2288_v39  ;;  %v2353_v42 = vpop.f32.mrb[17].mxu1  ;;  %v2291_v45 = vpop.f32.mrb[18].mxu0 }
 0x1d6   : > { %v2354_v44 = vadd.f32 %v2353_v42, %v2352_v32  ;;  %v2355_v46 = vpop.f32.mrb[18].mxu1  ;;  %v2292_v47 = vpop.f32.mrb[19].mxu0 }
 0x1d7   : > { %v1306_v48 = vadd.f32 %v2290_v41, %v3602_v10  ;;  %v2293_v49 = vadd.f32 %v2292_v47, %v2291_v45  ;;  %v2356_v50 = vpop.f32.mrb[19].mxu1 }
 0x1d8   : > { %v2357_v54 = vadd.f32 %v2356_v50, %v2355_v46 }
 0x1d9   : > { %v3629_v56 = vadd.f32 %v2354_v44, %v1306_v48  ;;  %v1309_v60 = vadd.f32 %v2293_v49, %v3602_v10 }
 0x1db   : > { %v3632_v62 = vadd.f32 %v2357_v54, %v1309_v60  ;;  %v2294_v63 = vpop.f32.mrb[20].mxu0 }
 0x1dc   : > { %v2358_v61 = vpop.f32.mrb[20].mxu1  ;;  %v2295_v4 = vpop.f32.mrb[21].mxu0 }
 0x1dd   : > { %v2296_v5 = vadd.f32 %v2295_v4, %v2294_v63  ;;  %v2359_v7 = vpop.f32.mrb[21].mxu1  ;;  %v2297_v11 = vpop.f32.mrb[22].mxu0 }
 0x1de   : > { %v2360_v13 = vadd.f32 %v2359_v7, %v2358_v61  ;;  %v2361_v21 = vpop.f32.mrb[22].mxu1  ;;  %v2298_v23 = vpop.f32.mrb[23].mxu0 }
 0x1df   : > { %v1314_v59 = vadd.f32 %v2296_v5, %v3602_v10  ;;  %v2299_v51 = vadd.f32 %v2298_v23, %v2297_v11  ;;  %v2362_v6 = vpop.f32.mrb[23].mxu1 }
 0x1e0   : > { %v2363_v2 = vadd.f32 %v2362_v6, %v2361_v21 }
 0x1e1   : > { %v3635_v8 = vadd.f32 %v2360_v13, %v1314_v59  ;;  %v1317_v9 = vadd.f32 %v2299_v51, %v3602_v10 }
 0x1e3   : > { %v3638_v15 = vadd.f32 %v2363_v2, %v1317_v9  ;;  %v2300_v17 = vpop.f32.mrb[24].mxu0 }
 0x1e4   : > { %v2364_v20 = vpop.f32.mrb[24].mxu1  ;;  %v2301_v22 = vpop.f32.mrb[25].mxu0 }
 0x1e5   : > { %v2302_v24 = vadd.f32 %v2301_v22, %v2300_v17  ;;  %v2365_v16 = vpop.f32.mrb[25].mxu1  ;;  %v2303_v29 = vpop.f32.mrb[26].mxu0 }
 0x1e6   : > { %v2366_v31 = vadd.f32 %v2365_v16, %v2364_v20  ;;  %v2367_v35 = vpop.f32.mrb[26].mxu1  ;;  %v2304_v30 = vpop.f32.mrb[27].mxu0 }
 0x1e7   : > { %v1322_v40 = vadd.f32 %v2302_v24, %v3602_v10  ;;  %v2305_v53 = vadd.f32 %v2304_v30, %v2303_v29  ;;  %v2368_v43 = vpop.f32.mrb[27].mxu1 }
 0x1e8   : > { %v2369_v57 = vadd.f32 %v2368_v43, %v2367_v35 }
 0x1e9   : > { %v3641_v0 = vadd.f32 %v2366_v31, %v1322_v40  ;;  %v1325_v12 = vadd.f32 %v2305_v53, %v3602_v10 }
 0x1eb   : > { %v3644_v14 = vadd.f32 %v2369_v57, %v1325_v12  ;;  %v2306_v25 = vpop.f32.mrb[28].mxu0 }
 0x1ec   : > { %v2370_v58 = vpop.f32.mrb[28].mxu1  ;;  %v2307_v18 = vpop.f32.mrb[29].mxu0 }
 0x1ed   : > { %v2308_v27 = vadd.f32 %v2307_v18, %v2306_v25  ;;  %v2371_v19 = vpop.f32.mrb[29].mxu1  ;;  %v2309_v28 = vpop.f32.mrb[30].mxu0 }
 0x1ee   : > { %v2372_v37 = vadd.f32 %v2371_v19, %v2370_v58  ;;  %v2373_v39 = vpop.f32.mrb[30].mxu1  ;;  %v2310_v32 = vpop.f32.mrb[31].mxu0 }
 0x1ef   : > { %v1330_v26 = vadd.f32 %v2308_v27, %v3602_v10  ;;  %v2311_v41 = vadd.f32 %v2310_v32, %v2309_v28  ;;  %v2374_v42 = vpop.f32.mrb[31].mxu1 }
 0x1f0   : > { %v2375_v45 = vadd.f32 %v2374_v42, %v2373_v39 }
 0x1f1   : > { %v3647_v44 = vadd.f32 %v2372_v37, %v1330_v26  ;;  %v1333_v46 = vadd.f32 %v2311_v41, %v3602_v10 }
 0x1f3   : > { %v3650_v47 = vadd.f32 %v2375_v45, %v1333_v46  ;;  %v2392_v48 = vpop.f32.mrb[32].mxu0 }
 0x1f4   : > { %v2456_v49 = vpop.f32.mrb[32].mxu1  ;;  %v2393_v50 = vpop.f32.mrb[33].mxu0 }
 0x1f5   : > { %v2394_v54 = vadd.f32 %v2393_v50, %v2392_v48  ;;  %v2457_v60 = vpop.f32.mrb[33].mxu1  ;;  %v2395_v63 = vpop.f32.mrb[34].mxu0 }
 0x1f6   : > { %v2458_v61 = vadd.f32 %v2457_v60, %v2456_v49  ;;  %v2459_v4 = vpop.f32.mrb[34].mxu1  ;;  %v2396_v5 = vpop.f32.mrb[35].mxu0 }
 0x1f7   : > { %v1468_v7 = vadd.f32 %v2394_v54, %v3605_v52  ;;  %v2397_v11 = vadd.f32 %v2396_v5, %v2395_v63  ;;  %v2460_v13 = vpop.f32.mrb[35].mxu1 }
 0x1f8   : > { %v2461_v21 = vadd.f32 %v2460_v13, %v2459_v4 }
 0x1f9   : > { %v1471_v23 = vadd.f32 %v2397_v11, %v3608_v55  ;;  %v3654_v59 = vadd.f32 %v2458_v61, %v1468_v7 }
 0x1fb   : > { %v2398_v10 = vpop.f32.mrb[36].mxu0  ;;  %v3656_v51 = vadd.f32 %v2461_v21, %v1471_v23 }
 0x1fc   : > { %v2462_v6 = vpop.f32.mrb[36].mxu1  ;;  %v2399_v2 = vpop.f32.mrb[37].mxu0 }
 0x1fd   : > { %v2400_v9 = vadd.f32 %v2399_v2, %v2398_v10  ;;  %v2463_v17 = vpop.f32.mrb[37].mxu1  ;;  %v2401_v20 = vpop.f32.mrb[38].mxu0 }
 0x1fe   : > { %v2464_v22 = vadd.f32 %v2463_v17, %v2462_v6  ;;  %v2465_v24 = vpop.f32.mrb[38].mxu1  ;;  %v2402_v16 = vpop.f32.mrb[39].mxu0 }
 0x1ff   : > { %v1476_v52 = vadd.f32 %v2400_v9, %v3611_v3  ;;  %v2403_v29 = vadd.f32 %v2402_v16, %v2401_v20  ;;  %v2466_v31 = vpop.f32.mrb[39].mxu1 }
 0x200   : > { %v2467_v35 = vadd.f32 %v2466_v31, %v2465_v24 }
 0x201   : > { %v1479_v55 = vadd.f32 %v2403_v29, %v3614_v1  ;;  %v3660_v30 = vadd.f32 %v2464_v22, %v1476_v52 }
 0x203   : > { %v2404_v40 = vpop.f32.mrb[40].mxu0  ;;  %v3662_v53 = vadd.f32 %v2467_v35, %v1479_v55 }
 0x204   : > { %v2468_v43 = vpop.f32.mrb[40].mxu1  ;;  %v2405_v57 = vpop.f32.mrb[41].mxu0 }
 0x205   : > { %v2406_v12 = vadd.f32 %v2405_v57, %v2404_v40  ;;  %v2469_v25 = vpop.f32.mrb[41].mxu1  ;;  %v2407_v58 = vpop.f32.mrb[42].mxu0 }
 0x206   : > { %v2470_v18 = vadd.f32 %v2469_v25, %v2468_v43  ;;  %v2471_v27 = vpop.f32.mrb[42].mxu1  ;;  %v2408_v19 = vpop.f32.mrb[43].mxu0 }
 0x207   : > { %v1484_v3 = vadd.f32 %v2406_v12, %v3617_v36  ;;  %v2409_v28 = vadd.f32 %v2408_v19, %v2407_v58  ;;  %v2472_v37 = vpop.f32.mrb[43].mxu1 }
 0x208   : > { %v2473_v39 = vadd.f32 %v2472_v37, %v2471_v27 }
 0x209   : > { %v1487_v1 = vadd.f32 %v2409_v28, %v3620_v33  ;;  %v3666_v32 = vadd.f32 %v2470_v18, %v1484_v3 }
 0x20b   : > { %v2410_v26 = vpop.f32.mrb[44].mxu0  ;;  %v3668_v41 = vadd.f32 %v2473_v39, %v1487_v1 }
 0x20c   : > { %v2474_v42 = vpop.f32.mrb[44].mxu1  ;;  %v2411_v45 = vpop.f32.mrb[45].mxu0 }
 0x20d   : > { %v2412_v46 = vadd.f32 %v2411_v45, %v2410_v26  ;;  %v2475_v48 = vpop.f32.mrb[45].mxu1  ;;  %v2413_v49 = vpop.f32.mrb[46].mxu0 }
 0x20e   : > { %v2476_v50 = vadd.f32 %v2475_v48, %v2474_v42  ;;  %v2477_v54 = vpop.f32.mrb[46].mxu1  ;;  %v2414_v60 = vpop.f32.mrb[47].mxu0 }
 0x20f   : > { %v1492_v36 = vadd.f32 %v2412_v46, %v3623_v34  ;;  %v2415_v63 = vadd.f32 %v2414_v60, %v2413_v49  ;;  %v2478_v61 = vpop.f32.mrb[47].mxu1 }
 0x210   : > { %v2479_v4 = vadd.f32 %v2478_v61, %v2477_v54 }
 0x211   : > { %v1495_v33 = vadd.f32 %v2415_v63, %v3626_v38  ;;  %v3672_v5 = vadd.f32 %v2476_v50, %v1492_v36 }
 0x213   : > { %v2416_v7 = vpop.f32.mrb[48].mxu0  ;;  %v3674_v11 = vadd.f32 %v2479_v4, %v1495_v33 }
 0x214   : > { %v2480_v13 = vpop.f32.mrb[48].mxu1  ;;  %v2417_v21 = vpop.f32.mrb[49].mxu0 }
 0x215   : > { %v2418_v23 = vadd.f32 %v2417_v21, %v2416_v7  ;;  %v2481_v10 = vpop.f32.mrb[49].mxu1  ;;  %v2419_v6 = vpop.f32.mrb[50].mxu0 }
 0x216   : > { %v2482_v2 = vadd.f32 %v2481_v10, %v2480_v13  ;;  %v2483_v9 = vpop.f32.mrb[50].mxu1  ;;  %v2420_v17 = vpop.f32.mrb[51].mxu0 }
 0x217   : > { %v1500_v34 = vadd.f32 %v2418_v23, %v3629_v56  ;;  %v2421_v20 = vadd.f32 %v2420_v17, %v2419_v6  ;;  %v2484_v22 = vpop.f32.mrb[51].mxu1 }
 0x218   : > { %v2485_v24 = vadd.f32 %v2484_v22, %v2483_v9 }
 0x219   : > { %v1503_v38 = vadd.f32 %v2421_v20, %v3632_v62  ;;  %v1597_v16 = vadd.f32 %v2482_v2, %v1500_v34 }
 0x21b   : > { %v2422_v52 = vpop.f32.mrb[52].mxu0  ;;  %v3678_v29 = vadd.f32 %v2485_v24, %v1503_v38 }
 0x21c   : > { %v2486_v31 = vpop.f32.mrb[52].mxu1  ;;  %v2423_v35 = vpop.f32.mrb[53].mxu0 }
 0x21d   : > { %v2424_v55 = vadd.f32 %v2423_v35, %v2422_v52  ;;  %v2487_v40 = vpop.f32.mrb[53].mxu1  ;;  %v2425_v43 = vpop.f32.mrb[54].mxu0 }
 0x21e   : > { %v2488_v57 = vadd.f32 %v2487_v40, %v2486_v31  ;;  %v2489_v12 = vpop.f32.mrb[54].mxu1  ;;  %v2426_v25 = vpop.f32.mrb[55].mxu0 }
 0x21f   : > { %v1508_v58 = vadd.f32 %v2424_v55, %v3635_v8  ;;  %v2427_v56 = vadd.f32 %v2426_v25, %v2425_v43  ;;  %v2490_v18 = vpop.f32.mrb[55].mxu1 }
 0x220   : > { %v2491_v27 = vadd.f32 %v2490_v18, %v2489_v12 }
 0x221   : > { %v1511_v19 = vadd.f32 %v2427_v56, %v3638_v15  ;;  %v1605_v62 = vadd.f32 %v2488_v57, %v1508_v58 }
 0x223   : > { %v2428_v3 = vpop.f32.mrb[56].mxu0  ;;  %v1608_v28 = vadd.f32 %v2491_v27, %v1511_v19 }
 0x224   : > { %v2492_v37 = vpop.f32.mrb[56].mxu1  ;;  %v2429_v39 = vpop.f32.mrb[57].mxu0 }
 0x225   : > { %v2430_v1 = vadd.f32 %v2429_v39, %v2428_v3  ;;  %v2493_v26 = vpop.f32.mrb[57].mxu1  ;;  %v2431_v42 = vpop.f32.mrb[58].mxu0 }
 0x226   : > { %v2494_v45 = vadd.f32 %v2493_v26, %v2492_v37  ;;  %v2495_v46 = vpop.f32.mrb[58].mxu1  ;;  %v2432_v48 = vpop.f32.mrb[59].mxu0 }
 0x227   : > { %v1516_v49 = vadd.f32 %v2430_v1, %v3641_v0  ;;  %v2433_v50 = vadd.f32 %v2432_v48, %v2431_v42  ;;  %v2496_v8 = vpop.f32.mrb[59].mxu1 }
 0x228   : > { %v2497_v54 = vadd.f32 %v2496_v8, %v2495_v46 }
 0x229   : > { %v1519_v60 = vadd.f32 %v2433_v50, %v3644_v14  ;;  %v1613_v36 = vadd.f32 %v2494_v45, %v1516_v49 }
 0x22b   : > { %v2434_v15 = vpop.f32.mrb[60].mxu0  ;;  %v1616_v63 = vadd.f32 %v2497_v54, %v1519_v60 }
 0x22c   : > { %v2498_v61 = vpop.f32.mrb[60].mxu1  ;;  %v2435_v4 = vpop.f32.mrb[61].mxu0 }
 0x22d   : > { %v2436_v33 = vadd.f32 %v2435_v4, %v2434_v15  ;;  %v2499_v7 = vpop.f32.mrb[61].mxu1  ;;  %v2437_v13 = vpop.f32.mrb[62].mxu0 }
 0x22e   : > { %v2500_v21 = vadd.f32 %v2499_v7, %v2498_v61  ;;  %v2501_v23 = vpop.f32.mrb[62].mxu1  ;;  %v2438_v10 = vpop.f32.mrb[63].mxu0 }
 0x22f   : > { %v1524_v6 = vadd.f32 %v2436_v33, %v3647_v44  ;;  %v2439_v2 = vadd.f32 %v2438_v10, %v2437_v13  ;;  %v2502_v0 = vpop.f32.mrb[63].mxu1 }
 0x230   : > { %v2503_v9 = vadd.f32 %v2502_v0, %v2501_v23 }
 0x231   : > { %v1527_v17 = vadd.f32 %v2439_v2, %v3650_v47  ;;  %v1621_v34 = vadd.f32 %v2500_v21, %v1524_v6 }
 0x233   : > { %v2547_v14 = vpop.f32.mrb[64].mxu0  ;;  %v1624_v20 = vadd.f32 %v2503_v9, %v1527_v17 }
 0x234   : > { %v3687_v22 = vadd.f32 %v2547_v14, %v3660_v30  ;;  %v2555_v24 = vpop.f32.mrb[64].mxu1  ;;  %v1661_v38 = vpop.f32.mrb[65].mxu0 }
 0x235   : > { %v3689_v52 = vadd.f32 %v2555_v24, %v1605_v62  ;;  %v3692_v31 = vadd.f32 %v1661_v38, %v3654_v59  ;;  %v1693_v35 = vpop.f32.mrb[65].mxu1  ;;  %v2548_v44 = vpop.f32.mrb[66].mxu0 }
 0x236   : > { %v1726_v55 = vmax.f32 %v3687_v22, 0.0  ;;  %v3695_v40 = vadd.f32 %v1693_v35, %v1597_v16  ;;  %v3698_v47 = vadd.f32 %v2548_v44, %v3662_v53  ;;  %v2556_v43 = vpop.f32.mrb[66].mxu1  ;;  %v1664_v57 = vpop.f32.mrb[67].mxu0 }
 0x237   : > { %v1734_v30 = vmax.f32 %v3689_v52, 0.0  ;;  %v1724_v12 = vmax.f32 %v3692_v31, 0.0  ;;  %v3702_v25 = vadd.f32 %v2556_v43, %v1608_v28  ;;  %v1665_v59 = vadd.f32 %v1664_v57, %v3656_v51  ;;  %v1696_v58 = vpop.f32.mrb[67].mxu1 }
 0x238   : > { %v1732_v56 = vmax.f32 %v3695_v40, 0.0  ;;  %v1727_v18 = vmax.f32 %v3698_v47, 0.0  ;;  %v1697_v16 = vadd.f32 %v1696_v58, %v3678_v29  ;;  %1746 = vst [vmem:[#allocation2 + $0x31] sm:$0xff] (!%p2238_p12), %v1726_v55 }
 0x239   : > { %v1735_v53 = vmax.f32 %v3702_v25, 0.0  ;;  %v1725_v27 = vmax.f32 %v1665_v59, 0.0  ;;  %1744 = vst [vmem:[#allocation2 + $0x11] sm:$0xff] (!%p2238_p12), %v1724_v12  ;;  %1754 = vst [vmem:[#allocation2 + $0xd1] sm:$0xff] (!%p2238_p12), %v1734_v30 }
 0x23a   : > { %v1733_v19 = vmax.f32 %v1697_v16, 0.0  ;;  %1747 = vst [vmem:[#allocation2 + $0x41] sm:$0xff] (!%p2238_p12), %v1727_v18  ;;  %1752 = vst [vmem:[#allocation2 + $0xb1] sm:$0xff] (!%p2238_p12), %v1732_v56 }
 0x23b   : > { %v2551_v62 = vpop.f32.mrb[68].mxu0  ;;  %1745 = vst [vmem:[#allocation2 + $0x21] sm:$0xff] (!%p2238_p12), %v1725_v27  ;;  %1755 = vst [vmem:[#allocation2 + $0xe1] sm:$0xff] (!%p2238_p12), %v1735_v53 }
 0x23c   : > { %v3710_v3 = vadd.f32 %v2551_v62, %v3672_v5  ;;  %v2559_v37 = vpop.f32.mrb[68].mxu1  ;;  %v1677_v28 = vpop.f32.mrb[69].mxu0  ;;  %1743 = sbr.rel (%p2238_p12) target bundleno = 581 (0x245), region = 76  ;;  %1753 = vst [vmem:[#allocation2 + $0xc1] sm:$0xff] (!%p2238_p12), %v1733_v19 }
 0x23d   : > { %v3712_v39 = vadd.f32 %v2559_v37, %v1621_v34  ;;  %v1678_v51 = vadd.f32 %v1677_v28, %v3666_v32  ;;  %v1709_v1 = vpop.f32.mrb[69].mxu1  ;;  %v2552_v26 = vpop.f32.mrb[70].mxu0 }
 0x23e   : > { %v1730_v42 = vmax.f32 %v3710_v3, 0.0  ;;  %v1710_v45 = vadd.f32 %v1709_v1, %v1613_v36  ;;  %v3717_v29 = vadd.f32 %v2552_v26, %v3674_v11  ;;  %v2560_v46 = vpop.f32.mrb[70].mxu1  ;;  %v1680_v48 = vpop.f32.mrb[71].mxu0 }
 0x23f   : > { %v1738_v49 = vmax.f32 %v3712_v39, 0.0  ;;  %v1728_v5 = vmax.f32 %v1678_v51, 0.0  ;;  %v3720_v50 = vadd.f32 %v2560_v46, %v1624_v20  ;;  %v1681_v8 = vadd.f32 %v1680_v48, %v3668_v41  ;;  %v1712_v54 = vpop.f32.mrb[71].mxu1 }
 0x240   : > { %v1736_v60 = vmax.f32 %v1710_v45, 0.0  ;;  %v1731_v32 = vmax.f32 %v3717_v29, 0.0  ;;  %v1713_v15 = vadd.f32 %v1712_v54, %v1616_v63  ;;  %1750 = vst [vmem:[#allocation2 + $0x71] sm:$0xff] (!%p2238_p12), %v1730_v42 }
 0x241   : > { %v1739_v61 = vmax.f32 %v3720_v50, 0.0  ;;  %v1729_v36 = vmax.f32 %v1681_v8, 0.0  ;;  %1748 = vst [vmem:[#allocation2 + $0x51] sm:$0xff] (!%p2238_p12), %v1728_v5  ;;  %1758 = vst [vmem:[#allocation2 + $0x111] sm:$0xff] (!%p2238_p12), %v1738_v49 }
 0x242   : > { %v1737_v4 = vmax.f32 %v1713_v15, 0.0  ;;  %1751 = vst [vmem:[#allocation2 + $0x81] sm:$0xff] (!%p2238_p12), %v1731_v32  ;;  %1756 = vst [vmem:[#allocation2 + $0xf1] sm:$0xff] (!%p2238_p12), %v1736_v60 }
 0x243   : > { %1749 = vst [vmem:[#allocation2 + $0x61] sm:$0xff] %v1729_v36  ;;  %1759 = vst [vmem:[#allocation2 + $0x121] sm:$0xff] %v1739_v61 }
 0x244   : > { %1757 = vst [vmem:[#allocation2 + $0x101] sm:$0xff] %v1737_v4 }
 0x245 PF: > { %p2239_p0 = scmp.ne.s32.totalorder %s3074_s4, 7 }
 0x246   : > { %v2240_v41 = vld [vmem:[#allocation9] ss:$0 sm:$0xff] (!%p2239_p0)  ;;  %v3007_v33 = vmov (!%p2239_p0), 0   ;;  %v1845_v24 = vld [vmem:[#allocation10] sm:$0xff] (!%p2239_p0)  ;;  %v1846_v38 = vld [vmem:[#allocation10 + $0x8] sm:$0xff] (!%p2239_p0)  ;;  %v3008_v52 = vmov (!%p2239_p0), 0.0|0.0   ;;  %v1876_v39 = vlaneseq (!%p2239_p0) }
 0x247   : > { %1763 = sbr.rel (%p2239_p0) target bundleno = 993 (0x3e1), region = 80  ;;  %v1771_v11 = vmul.f32 (!%p2239_p0), %v2240_v41, %v1724_v12  ;;  %v1779_v63 = vmul.f32 (!%p2239_p0), %v2240_v41, %v1732_v56  ;;  %2774 = vset.pattern.permute.xlu0 (!%p2239_p0), %v3007_v33  ;;  %v1772_v7 = vmul.f32 (!%p2239_p0), %v2240_v41, %v1725_v27  ;;  %v1780_v13 = vmul.f32 (!%p2239_p0), %v2240_v41, %v1733_v19  ;;  %v2241_v35 = vld [vmem:[#allocation3] ss:$0 sm:$0xff] (!%p2239_p0)  ;;  %v1847_v44 = vld [vmem:[#allocation10 + $0x10] sm:$0xff] (!%p2239_p0)  ;;  %v1849_v47 = vld [vmem:[#allocation10 + $0x20] sm:$0xff] (!%p2239_p0) }
 0x248   : > { %v1773_v21 = vmul.f32 (!%p2239_p0), %v2240_v41, %v1726_v55  ;;  %v1781_v23 = vmul.f32 (!%p2239_p0), %v2240_v41, %v1734_v30  ;;  %v1774_v10 = vmul.f32 (!%p2239_p0), %v2240_v41, %v1727_v18  ;;  %v1782_v6 = vmul.f32 (!%p2239_p0), %v2240_v41, %v1735_v53  ;;  %2580 = vmatprep.subr.bf16.mxu0 (!%p2239_p0), %v3008_v52  ;;  %v1848_v55 = vld [vmem:[#allocation10 + $0x18] sm:$0xff] (!%p2239_p0)  ;;  %v1850_v43 = vld [vmem:[#allocation10 + $0x28] sm:$0xff] (!%p2239_p0)  ;;  %v1851_v12 = vld [vmem:[#allocation10 + $0x30] sm:$0xff] (!%p2239_p0) }
 0x249   : > { %1787 = vadd.xlane.f32.xlu0 (!%p2239_p0), %v1771_v11  ;;  %1803 = vadd.xlane.f32.xlu1 (!%p2239_p0), %v1779_v63  ;;  %v1775_v2 = vmul.f32 (!%p2239_p0), %v2240_v41, %v1728_v5  ;;  %v1783_v0 = vmul.f32 (!%p2239_p0), %v2240_v41, %v1736_v60  ;;  %v1776_v9 = vmul.f32 (!%p2239_p0), %v2240_v41, %v1729_v36  ;;  %vm3009_vm0 = vmmov (!%p2239_p0), 0   ;;  %v1852_v25 = vld [vmem:[#allocation10 + $0x38] sm:$0xff] (!%p2239_p0) }
 0x24a   : > { %v1784_v17 = vmul.f32 (!%p2239_p0), %v2240_v41, %v1737_v4  ;;  %v1777_v34 = vmul.f32 (!%p2239_p0), %v2240_v41, %v1730_v42  ;;  %v1785_v14 = vmul.f32 (!%p2239_p0), %v2240_v41, %v1738_v49  ;;  %v1778_v20 = vmul.f32 (!%p2239_p0), %v2240_v41, %v1731_v32 }
 0x24b   : > { %v1786_v22 = vmul.f32 (!%p2239_p0), %v2240_v41, %v1739_v61  ;;  %v2581_v31 = vpack.c.bf16 (!%p2239_p0), %v1846_v38, %v1845_v24  ;;  %v2584_v40 = vpack.c.bf16 (!%p2239_p0), %v1848_v55, %v1847_v44  ;;  %v3010_v57 = vmov (!%p2239_p0), 0.0  }
 0x24c   : > { %2577 = vmatprep.mubr.msk.f32.mxu0 (!%p2239_p0), %vm3009_vm0, %v3010_v57  ;;  %v2587_v30 = vpack.c.bf16 (!%p2239_p0), %v1850_v43, %v1849_v47  ;;  %v2590_v59 = vpack.c.bf16 (!%p2239_p0), %v1852_v25, %v1851_v12  ;;  %v1877_v1 = vand.u32 (!%p2239_p0), 127, %v1876_v39  ;;  %v1879_v42 = vshrl.u32 (!%p2239_p0), %v1876_v39, 7 }
 0x24d   : > { %1789 = vadd.xlane.f32.xlu0 (!%p2239_p0), %v1772_v7  ;;  %1805 = vadd.xlane.f32.xlu1 (!%p2239_p0), %v1780_v13  ;;  %vm1887_vm1 = vcmask (!%p2239_p0), 130112   ;;  %vm1894_vm2 = vcmask (!%p2239_p0), 195712   ;;  %vm1901_vm3 = vcmask (!%p2239_p0), 261312   ;;  %vm1908_vm4 = vcmask (!%p2239_p0), 326912  }
 0x24e   : > { %2582 = vmatpush3.bf16.msra.mxu0 %v2581_v31  ;;  %v1882_v45 = vadd.s32 4294967288, %v1877_v1  ;;  %v1889_v29 = vadd.s32 4294967280, %v1877_v1  ;;  %v1896_v46 = vadd.s32 4294967272, %v1877_v1  ;;  %v1903_v49 = vadd.s32 4294967264, %v1877_v1 }
 0x24f   : > { %2583 = vmatprep.subr.bf16.mxu0 %v3008_v52  ;;  %v1910_v5 = vadd.s32 4294967256, %v1877_v1  ;;  %v1917_v50 = vadd.s32 4294967248, %v1877_v1  ;;  %v1924_v8 = vadd.s32 4294967240, %v1877_v1  ;;  %v1880_v54 = vsub.s32 %v1877_v1, %v1879_v42 }
 0x250   : > { %v1885_v32 = vsub.s32 %v1882_v45, %v1879_v42  ;;  %v1892_v15 = vsub.s32 %v1889_v29, %v1879_v42  ;;  %v1899_v61 = vsub.s32 %v1896_v46, %v1879_v42  ;;  %v1906_v4 = vsub.s32 %v1903_v49, %v1879_v42  ;;  %v2242_v46 = vld [vmem:[#allocation12] ss:$0 sm:$0xff] }
 0x251   : > { %1791 = vadd.xlane.f32.xlu0 %v1773_v21  ;;  %1807 = vadd.xlane.f32.xlu1 %v1781_v23  ;;  %v1913_v41 = vsub.s32 %v1910_v5, %v1879_v42  ;;  %v1920_v11 = vsub.s32 %v1917_v50, %v1879_v42  ;;  %v1927_v63 = vsub.s32 %v1924_v8, %v1879_v42  ;;  %vm1915_vm5 = vcmask 392512  }
 0x252   : > { %2585 = vmatpush3.bf16.msra.mxu0 %v2584_v40  ;;  %vm1922_vm6 = vcmask 458112   ;;  %vm1929_vm7 = vcmask 523712   ;;  %vm1970_vm8 = vcmask 1041409   ;;  %vm1972_vm9 = vcmask 523264  }
 0x253   : > { %2586 = vmatprep.subr.bf16.mxu0 %v3008_v52  ;;  %vm2045_vm10 = vcmask 517120  }
 0x255   : > { %1793 = vadd.xlane.f32.xlu0 %v1774_v10  ;;  %1809 = vadd.xlane.f32.xlu1 %v1782_v6 }
 0x256   : > { %2588 = vmatpush3.bf16.msra.mxu0 %v2587_v30 }
 0x257   : > { %2589 = vmatprep.subr.bf16.mxu0 %v3008_v52 }
 0x259   : > { %1795 = vadd.xlane.f32.xlu0 %v1775_v2  ;;  %1811 = vadd.xlane.f32.xlu1 %v1783_v0 }
 0x25a   : > { %2591 = vmatpush3.bf16.msra.mxu0 %v2590_v59 }
 0x25d   : > { %1797 = vadd.xlane.f32.xlu0 %v1776_v9  ;;  %1813 = vadd.xlane.f32.xlu1 %v1784_v17 }
 0x261   : > { %1799 = vadd.xlane.f32.xlu0 %v1777_v34  ;;  %1815 = vadd.xlane.f32.xlu1 %v1785_v14 }
 0x265   : > { %1801 = vadd.xlane.f32.xlu0 %v1778_v20  ;;  %1817 = vadd.xlane.f32.xlu1 %v1786_v22 }
 0x27b   : > { %1826 = vperm.xlu0 %2774, %v2241_v35  }
 0x2d6   : > { %v1788_v58 = vpop.xlane.xlu0 %1787  ;;  %v1804_v56 = vpop.xlane.xlu1 %1803 }
 0x2da   : > { %v1790_v18 = vpop.xlane.xlu0 %1789  ;;  %v1806_v16 = vpop.xlane.xlu1 %1805 }
 0x2de   : > { %v1792_v53 = vpop.xlane.xlu0 %1791  ;;  %v1808_v27 = vpop.xlane.xlu1 %1807 }
 0x2e2   : > { %v1794_v19 = vpop.xlane.xlu0 %1793  ;;  %v1810_v3 = vpop.xlane.xlu1 %1809 }
 0x2e6   : > { %v1796_v62 = vpop.xlane.xlu0 %1795  ;;  %v1812_v28 = vpop.xlane.xlu1 %1811 }
 0x2ea   : > { %v1798_v37 = vpop.xlane.xlu0 %1797  ;;  %v1814_v26 = vpop.xlane.xlu1 %1813 }
 0x2ee   : > { %v1800_v51 = vpop.xlane.xlu0 %1799  ;;  %v1816_v60 = vpop.xlane.xlu1 %1815 }
 0x2f2   : > { %v1802_v48 = vpop.xlane.xlu0 %1801  ;;  %v1818_v17 = vpop.xlane.xlu1 %1817 }
 0x2fa   : > { %v1827_v36 = vpop.permute.xlu0 %1826 }
 0x2fb   : > { %v1829_v33 = vadd.f32 %v1827_v36, %v1788_v58  ;;  %v1830_v7 = vadd.f32 %v1827_v36, %v1790_v18  ;;  %v1831_v13 = vadd.f32 %v1827_v36, %v1792_v53  ;;  %v1832_v21 = vadd.f32 %v1827_v36, %v1794_v19 }
 0x2fc   : > { %v1837_v23 = vadd.f32 %v1827_v36, %v1804_v56  ;;  %v1838_v10 = vadd.f32 %v1827_v36, %v1806_v16  ;;  %v1839_v6 = vadd.f32 %v1827_v36, %v1808_v27  ;;  %v1833_v2 = vadd.f32 %v1827_v36, %v1796_v62 }
 0x2fd   : > { %v1834_v0 = vadd.f32 %v1827_v36, %v1798_v37  ;;  %v1835_v9 = vadd.f32 %v1827_v36, %v1800_v51  ;;  %v1840_v34 = vadd.f32 %v1827_v36, %v1810_v3  ;;  %v1881_v14 = vrot.slane %v1829_v33, %v1880_v54 }
 0x2fe   : > { %v1886_v20 = vrot.slane %v1830_v7, %v1885_v32  ;;  %v1893_v22 = vrot.slane %v1831_v13, %v1892_v15  ;;  %v1836_v24 = vadd.f32 %v1827_v36, %v1802_v48  ;;  %v1841_v38 = vadd.f32 %v1827_v36, %v1812_v28 }
 0x2ff   : > { %v1842_v52 = vadd.f32 %v1827_v36, %v1814_v26  ;;  %v1900_v31 = vrot.slane %v1832_v21, %v1899_v61  ;;  %v1934_v44 = vrot.slane %v1837_v23, %v1880_v54  ;;  %v1938_v55 = vrot.slane %v1838_v10, %v1885_v32 }
 0x300   : > { %v1888_v35 = vsel %vm1887_vm1, %v1886_v20, %v1881_v14  ;;  %v1943_v40 = vrot.slane %v1839_v6, %v1892_v15  ;;  %v1843_v47 = vadd.f32 %v1827_v36, %v1816_v60  ;;  %v1844_v43 = vadd.f32 %v1827_v36, %v1818_v17 }
 0x301   : > { %v1895_v57 = vsel %vm1894_vm2, %v1893_v22, %v1888_v35  ;;  %v1907_v30 = vrot.slane %v1833_v2, %v1906_v4  ;;  %v1914_v25 = vrot.slane %v1834_v0, %v1913_v41  ;;  %v1939_v59 = vsel %vm1887_vm1, %v1938_v55, %v1934_v44 }
 0x302   : > { %v1902_v12 = vsel %vm1901_vm3, %v1900_v31, %v1895_v57  ;;  %v1948_v58 = vrot.slane %v1840_v34, %v1899_v61  ;;  %v1921_v18 = vrot.slane %v1835_v9, %v1920_v11  ;;  %v1944_v16 = vsel %vm1894_vm2, %v1943_v40, %v1939_v59 }
 0x303   : > { %v1909_v56 = vsel %vm1908_vm4, %v1907_v30, %v1902_v12  ;;  %v1953_v53 = vrot.slane %v1841_v38, %v1906_v4  ;;  %v1928_v19 = vrot.slane %v1836_v24, %v1927_v63  ;;  %v1958_v3 = vrot.slane %v1842_v52, %v1913_v41 }
 0x304   : > { %v1916_v27 = vsel %vm1915_vm5, %v1914_v25, %v1909_v56  ;;  %v1949_v62 = vsel %vm1901_vm3, %v1948_v58, %v1944_v16  ;;  %v1963_v39 = vrot.slane %v1843_v47, %v1920_v11  ;;  %v1968_v26 = vrot.slane %v1844_v43, %v1927_v63 }
 0x305   : > { %v1923_v37 = vsel %vm1922_vm6, %v1921_v18, %v1916_v27  ;;  %v1954_v28 = vsel %vm1908_vm4, %v1953_v53, %v1949_v62 }
 0x306   : > { %v1930_v51 = vsel %vm1929_vm7, %v1928_v19, %v1923_v37  ;;  %v1959_v1 = vsel %vm1915_vm5, %v1958_v3, %v1954_v28 }
 0x307   : > { %v1964_v42 = vsel %vm1922_vm6, %v1963_v39, %v1959_v1 }
 0x308   : > { %v1969_v45 = vsel %vm1929_vm7, %v1968_v26, %v1964_v42 }
 0x309   : > { %v1971_v29 = vsel %vm1970_vm8, %v1969_v45, %v1930_v51 }
 0x30a   : > { %2578 = vmatmul.mubr.msk.f32.vlgmr.msra.gmra.mrb[0].mxu0 %vm1972_vm9, %v1971_v29 }
 0x3dd   : > { %v2041_v48 = vpop.f32.mrb[0].mxu0 }
 0x3de   : > { %v2042_v49 = vadd.f32 %v2242_v46, %v2041_v48  ;;  %v2579_v5 = vpop.f32.mrb[1].mxu0 }
 0x3e0   : > { %2046 = vst.msk [vmem:[#allocation13] sm:$0x3] %vm2045_vm10, %v2042_v49 }
 0x3e1 PF: > { %p2655_p2 = scmp.eq.s32.totalorder %s3074_s4, 7  ;;  %s3011_s22 = smov [#allocation13]  }
 0x3e2   : > { %s2054_s16 = sshll.u32 %s3011_s22, 4  ;;  %s2055_s16 = int_to_ptr.vmem [resolvable:$true] %s2054_s16 }
 0x3e3   : > { %s2919_s13 = scalar_lea.vmem %s2055_s16, 32  ;;  %p2926_p10 = scmp.lt.s32.totalorder %s2055_s16, %s2055_s16 }
 0x3e4   : > { %p2920_p13 = scmp.ne.s32.totalorder %s2055_s16, %s2919_s13  ;;  %p2927_p7 = scmp.lt.s32.totalorder %s2919_s13, %s2919_s13 }
 0x3e6   : > { %p2921_p3 = pnand %p2920_p13, %p2655_p2  ;;  %p2928_p6 = por %p2927_p7, %p2926_p10 }
 0x3e8   : > { %p2922_p9 = pneg %p2921_p3 }
 0x3ea   : > { %p2929_p8 = pnand %p2928_p6, %p2922_p9 }
 0x3ec   : > { %2932 = shalt.err (!%p2929_p8)
}
 0x3ed   : > { %s2933_s30 = scalar_lea.hbm %s3804_s7, 32 }
 0x3ee   : > { %p2934_p11 = scmp.ne.s32.totalorder %s3804_s7, %s2933_s30  ;;  %p2939_p5 = scmp.lt.u32.totalorder %s2933_s30, %s3804_s7 }
 0x3f0   : > { %p2935_p1 = pnand %p2934_p11, %p2655_p2 }
 0x3f2   : > { %p2936_p4 = pneg %p2935_p1 }
 0x3f4   : > { %p2941_p12 = pnand %p2939_p5, %p2936_p4 }
 0x3f6   : > { %2944 = shalt.err (!%p2941_p12)
}
 0x3f7   : > { %2628 = dma.vmem_to_hbm [thread:$0]  (%p2655_p2), %s2055_s16, 32, %s3804_s7, [#allocation6]  }
 0x3f8   : > { %2978 = dma.done.wait (%p2655_p2), [#allocation6], 32  }
 0x3f9   : > { %2980 = vsyncadd (%p2655_p2), [#allocation6], 4294967264 }
 0x3fa PF: > { %p24_p0 = scmp.ge.s32.totalorder %s3170_s21, 10   ;;  %s3820_s26 = smov %s2987_s27 }
 0x3fb   : > { %s3821_s27 = smov %s2991_s28  ;;  %s3822_s28 = smov %s3180_s23 }
 0x3fc   : > { %s3823_s29 = smov %s3170_s21  ;;  %26 = sbr.rel (!%p24_p0) target bundleno = 10 (0xa), region = 125 }
 0x403   :  { %2067 = vsyncpa [#allocation5], 1 }
 0x404   :  { %2069 = vsyncpa [#allocation5 + $0x1], 1 }
 0x405   :  { %2070 = vsyncpa [#allocation8], 1 }
 0x406   :  { %2072 = vsyncpa [#allocation8 + $0x1], 1 }
 0x407   :  { %2073 = vsyncpa [#allocation11], 1 }
 0x408   :  { %2074 = vsyncpa [#allocation6], 1 }
 0x409   :  { %2076 = vsyncpa [#allocation6 + $0x1], 1 }

</bundles_post_ra>
